<compile_context>
chip_gen: v6e
topology: v6e:2x2x1
jax: 0.10.0
libtpu: 0.0.40
codegen_flags: <defaults>
</compile_context>

<pallas_src>
import functools

import jax
import jax.numpy as jnp
from jax.experimental import pallas as pl
from jax.experimental.pallas import tpu as pltpu

LN_EPS = 1e-5


def _vmem_limit_bytes():
    # Generation-aware VMEM cap: ~48 MiB on v7x (64 MiB physical),
    # up to 96 MiB on v5e/v6e (128 MiB physical).
    try:
        cap = int(pltpu.get_tpu_info().vmem_capacity_bytes)
    except Exception:
        cap = 64 * 1024 * 1024
    return int(min(96 * 1024 * 1024, (cap * 3) // 4))


def _layer_norm(v, gamma, beta):
    mu = jnp.mean(v, axis=-1, keepdims=True)
    var = jnp.mean(jnp.square(v - mu), axis=-1, keepdims=True)
    return (v - mu) * jax.lax.rsqrt(var + LN_EPS) * gamma + beta


# ----------------------------------------------------------------------------
# Fused whole-encoder kernel: one (batch b, layer l) grid step.
# ----------------------------------------------------------------------------
def fused_encoder_kernel(sc_ref, x0_ref, wzvg_ref, wo_ref, w1_ref, w2_ref,
                         vecs_ref, inner_ref, x_sc, hs_sc, *, T, D, Z, H, F):
    """Computes, for batch b and layer l (calculate_num==2, 'ema'):

        k1 = mega(x); k2 = mega(x + k1)
        x2 = x + a(1-a)*k1 + a*k2            # RK2 'ema' combine
        hs = hs + x2                         # history.add(x)
        x3 = mega(hs / n)                    # history.pop() -> layers[i]
        hs = hs - x2 + x3                    # history.update(x)
        x  = hs / n                          # history.refine()

    x / hs live in VMEM scratch across the layer ("arbitrary") grid axis; only
    the bf16 inner_state block is written back per layer.
    """
    l = pl.program_id(1)

    # history.clean(); history.add(embedding); x = embedding   (once per batch)
    @pl.when(l == 0)
    def _():
        x0 = x0_ref[0].astype(jnp.float32)          # (T, D)
        x_sc[...] = x0
        hs_sc[...] = x0

    c1 = sc_ref[l, 0]        # alpha * (1 - alpha)
    c2 = sc_ref[l, 1]        # alpha
    inv_n = sc_ref[l, 2]     # 1 / (#history entries after this layer's add)

    vecs = vecs_ref[0]                     # (10, Vmax) f32, rows zero-padded
    gq, bq = vecs[0:1, :Z], vecs[1:2, :Z]
    gk, bk = vecs[2:3, :Z], vecs[3:4, :Z]
    ln1g, ln1b = vecs[4:5, :D], vecs[5:6, :D]
    b1 = vecs[6:7, :F]
    b2 = vecs[7:8, :D]
    ln2g, ln2b = vecs[8:9, :D], vecs[9:10, :D]

    wzvg = wzvg_ref[0]       # bf16 (D, P): [wz | wv | wg | 0-pad], P = 128k
    wo = wo_ref[0]           # bf16 (H, D)
    w1 = w1_ref[0]           # bf16 (D, F)
    w2 = w2_ref[0]           # bf16 (F, D)
    scale = float(Z) ** -0.5

    def mega(xin):           # (T, D) f32 -> (T, D) f32: one Mega encoder layer
        # Fused z/v/gate projection: one lane-dense (N=128) bf16 MXU matmul.
        zvg = jnp.dot(xin.astype(jnp.bfloat16), wzvg,
                      preferred_element_type=jnp.float32)              # (T, P)
        z = zvg[:, :Z]
        v = jax.nn.silu(zvg[:, Z:Z + H])                               # (T, H)
        g = jax.nn.sigmoid(zvg[:, Z + H:Z + H + D])                    # (T, D)

        q = z * gq + bq
        k = z * gk + bk
        # Per-batch 2-D attention (padding_mask is None in the reference).
        # TODO(synk): query-chunked online softmax for long T on v7x.
        s = jax.lax.dot_general(q.astype(jnp.bfloat16), k.astype(jnp.bfloat16),
                                (((1,), (1,)), ((), ())),
                                preferred_element_type=jnp.float32) * scale
        m = jnp.max(s, axis=-1, keepdims=True)
        e = jnp.exp(s - m)
        p = e * pl.reciprocal(jnp.sum(e, axis=-1, keepdims=True), approx=True)
        h = jnp.dot(p.astype(jnp.bfloat16), v.astype(jnp.bfloat16),
                    preferred_element_type=jnp.float32)                # (T, H)

        o = jax.nn.silu(jnp.dot(h.astype(jnp.bfloat16), wo,
                                preferred_element_type=jnp.float32))   # (T, D)
        y = g * o + (1.0 - g) * xin
        y = _layer_norm(y, ln1g, ln1b)                                 # post-norm

        f = jax.nn.silu(jnp.dot(y.astype(jnp.bfloat16), w1,
                                preferred_element_type=jnp.float32) + b1)
        f = jnp.dot(f.astype(jnp.bfloat16), w2,
                    preferred_element_type=jnp.float32) + b2
        return _layer_norm(y + f, ln2g, ln2b)

    residual = x_sc[...]
    hs = hs_sc[...]
    k1 = mega(residual)
    k2 = mega(residual + k1)
    x2 = residual + c1 * k1 + c2 * k2      # RK2 'ema' combine
    hs = hs + x2                           # history.add(x)
    x3 = mega(hs * inv_n)                  # history.pop() -> layers[i]
    hs = hs + (x3 - x2)                    # history.update(x)
    xo = hs * inv_n                        # history.refine()

    x_sc[...] = xo
    hs_sc[...] = hs
    inner_ref[...] = xo[None, None].astype(inner_ref.dtype)


# ----------------------------------------------------------------------------
# Wrapper: one pallas_call for the whole encoder stack.
# ----------------------------------------------------------------------------
def ode_mega_sc_raw_encoder(tokens, src_lengths, params, last_state_only=False):
    del src_lengths  # sen_rep_type='cls' does not use src_lengths

    B, T = tokens.shape
    D = params["embed_w"].shape[1]
    L = params["num_layers"]
    Z, H, F = params["Z"], params["H"], params["F"]
    P = params["wzvg"].shape[-1]
    VMAX = params["vecs"].shape[-1]

    # RealNumberEmbedding (D**-0.5 scale folded into the weight): plain XLA
    # broadcast multiply; dropout=0 -> identity. bf16 at the HBM boundary.
    w_scaled = params["embed_w"] * (float(D) ** -0.5)                     # (1, D)
    x0 = (tokens[:, :, None] * w_scaled[None, :, :]).astype(jnp.bfloat16)  # (B,T,D)

    # Per-layer scalar table (SMEM): [alpha*(1-alpha), alpha, 1/n_history].
    alpha = params["alpha"].astype(jnp.float32)
    c1 = alpha * (1.0 - alpha)
    c2 = alpha
    inv_n = 1.0 / (jnp.arange(L, dtype=jnp.float32) + 2.0)
    scalars = jnp.stack([jnp.full((L,), c1), jnp.full((L,), c2), inv_n], axis=1)

    kernel = functools.partial(fused_encoder_kernel, T=T, D=D, Z=Z, H=H, F=F)
    inner = pl.pallas_call(
        kernel,
        out_shape=jax.ShapeDtypeStruct((L, B, T, D), jnp.bfloat16),
        grid_spec=pltpu.PrefetchScalarGridSpec(
            num_scalar_prefetch=0,
            grid=(B, L),
            in_specs=[
                pl.BlockSpec(memory_space=pltpu.MemorySpace.SMEM),      # scalars
                pl.BlockSpec((1, T, D), lambda b, l: (b, 0, 0)),        # x0 (resident per b)
                pl.BlockSpec((1, D, P), lambda b, l: (l, 0, 0)),        # wzvg (streamed per l)
                pl.BlockSpec((1, H, D), lambda b, l: (l, 0, 0)),        # wo
                pl.BlockSpec((1, D, F), lambda b, l: (l, 0, 0)),        # w1
                pl.BlockSpec((1, F, D), lambda b, l: (l, 0, 0)),        # w2
                pl.BlockSpec((1, 10, VMAX), lambda b, l: (l, 0, 0)),    # small vectors
            ],
            out_specs=pl.BlockSpec((1, 1, T, D), lambda b, l: (l, b, 0, 0)),
            scratch_shapes=[pltpu.VMEM((T, D), jnp.float32),            # x (carried over l)
                            pltpu.VMEM((T, D), jnp.float32)],           # history running sum
        ),
        compiler_params=pltpu.CompilerParams(
            dimension_semantics=("parallel", "arbitrary"),
            vmem_limit_bytes=_vmem_limit_bytes(),
        ),
    )(scalars, x0, params["wzvg"], params["wo"], params["w1"], params["w2"],
      params["vecs"])

    x_last = inner[L - 1]                  # (B, T, D) bf16
    # Final history.pop(): with the uniform running-mean history it equals the
    # last layer's refine output, which x_last already holds.  final_norm is
    # None (normalize_before=False).
    sentence_rep = x_last[:, 0, :]         # == x[0, :, :] in T x B x C ('cls')

    if last_state_only:
        states_btd = [x_last]
    else:
        states_btd = [x0] + [inner[i] for i in range(L)]
    # restore PyTorch T x B x C convention for the returned states
    inner_states_tbc = [jnp.transpose(s, (1, 0, 2)) for s in states_btd]
    return inner_states_tbc, sentence_rep


# ----------------------------------------------------------------------------
# Parameter init (deterministic, synthetic) — weights stacked as (L, ...)
# ----------------------------------------------------------------------------
def _xavier(key, shape):
    fan_in, fan_out = shape
    bound = (6.0 / (fan_in + fan_out)) ** 0.5
    return jax.random.uniform(key, shape, jnp.float32, -bound, bound)


def init_params(key, num_layers, D, Z, H, F):
    P = ((Z + H + D + 127) // 128) * 128       # lane-dense fused-projection width
    VMAX = max(Z, D, F)
    k_emb, k_layers = jax.random.split(key)
    layer_keys = jax.random.split(k_layers, num_layers)

    wzvg_l, wo_l, w1_l, w2_l, vecs_l = [], [], [], [], []
    for i in range(num_layers):
        ks = jax.random.split(layer_keys[i], 8)
        wz = _xavier(ks[0], (D, Z))
        wv = _xavier(ks[1], (D, H))
        wg = _xavier(ks[2], (D, D))
        wzvg = jnp.concatenate([wz, wv, wg], axis=1)                 # (D, Z+H+D)
        wzvg = jnp.pad(wzvg, ((0, 0), (0, P - wzvg.shape[1])))       # pad to 128 cols
        wzvg_l.append(wzvg.astype(jnp.bfloat16))
        wo_l.append(_xavier(ks[3], (H, D)).astype(jnp.bfloat16))
        w1_l.append(_xavier(ks[4], (D, F)).astype(jnp.bfloat16))
        w2_l.append(_xavier(ks[5], (F, D)).astype(jnp.bfloat16))

        gq = 0.1 * jax.random.normal(ks[6], (Z,), jnp.float32) + 1.0
        gk = 0.1 * jax.random.normal(ks[7], (Z,), jnp.float32) + 1.0

        def pad(v):
            return jnp.pad(v, (0, VMAX - v.shape[0]))

        # Row layout (must match kernel unpack):
        # 0:gq 1:bq 2:gk 3:bk 4:ln1g 5:ln1b 6:b1 7:b2 8:ln2g 9:ln2b
        vecs = jnp.stack([
            pad(gq), pad(jnp.zeros((Z,), jnp.float32)),
            pad(gk), pad(jnp.zeros((Z,), jnp.float32)),
            pad(jnp.ones((D,), jnp.float32)), pad(jnp.zeros((D,), jnp.float32)),
            pad(jnp.zeros((F,), jnp.float32)),
            pad(jnp.zeros((D,), jnp.float32)),
            pad(jnp.ones((D,), jnp.float32)), pad(jnp.zeros((D,), jnp.float32)),
        ], axis=0)
        vecs_l.append(vecs)

    return {
        "num_layers": num_layers,
        "Z": Z, "H": H, "F": F,
        "embed_w": jax.random.normal(k_emb, (1, D), jnp.float32),  # RealNumberEmbedding weight
        "alpha": jnp.float32(0.5),                                 # self.alpha.data.fill_(0.5)
        "wzvg": jnp.stack(wzvg_l, axis=0),     # (L, D, P)   bf16
        "wo": jnp.stack(wo_l, axis=0),         # (L, H, D)   bf16
        "w1": jnp.stack(w1_l, axis=0),         # (L, D, F)   bf16
        "w2": jnp.stack(w2_l, axis=0),         # (L, F, D)   bf16
        "vecs": jnp.stack(vecs_l, axis=0),     # (L, 10, VMAX) f32
    }


# ----------------------------------------------------------------------------
if __name__ == "__main__":
    B, T = 2, 8
    D, Z, H, F = 32, 16, 64, 64
    NUM_LAYERS = 2

    key = jax.random.PRNGKey(0)
    k_params, k_tok = jax.random.split(key)
    params = init_params(k_params, NUM_LAYERS, D, Z, H, F)

    tokens = jax.random.normal(k_tok, (B, T), jnp.float32)     # real-valued raw input
    src_lengths = jnp.full((B,), T, jnp.float32)

    inner_states, sentence_rep = ode_mega_sc_raw_encoder(tokens, src_lengths, params)

    for s in inner_states:
        jax.block_until_ready(s)
    jax.block_until_ready(sentence_rep)

    assert sentence_rep.shape == (B, D)
    assert len(inner_states) == NUM_LAYERS + 1
    assert all(s.shape == (T, B, D) for s in inner_states)
    print("KERNEL_OK")
</pallas_src>

<mosaic_0001>
module attributes {stable_mosaic.version = 11 : i64} {
  func.func @fused_encoder_kernel(%arg0: i32, %arg1: i32, %arg2: memref<2x3xf32, #tpu.memory_space<smem>>, %arg3: memref<1x8x32xbf16, #tpu.memory_space<vmem>>, %arg4: memref<1x32x128xbf16, #tpu.memory_space<vmem>>, %arg5: memref<1x64x32xbf16, #tpu.memory_space<vmem>>, %arg6: memref<1x32x64xbf16, #tpu.memory_space<vmem>>, %arg7: memref<1x64x32xbf16, #tpu.memory_space<vmem>>, %arg8: memref<1x10x64xf32, #tpu.memory_space<vmem>>, %arg9: memref<1x1x8x32xbf16, #tpu.memory_space<vmem>>, %arg10: memref<8x32xf32, #tpu.memory_space<vmem>>, %arg11: memref<8x32xf32, #tpu.memory_space<vmem>>) attributes {dimension_semantics = [#tpu.dimension_semantics<parallel>, #tpu.dimension_semantics<arbitrary>], iteration_bounds = array<i64: 2, 2>, scalar_prefetch = 0 : i64, scratch_operands = 2 : i64, tpu.core_type = #tpu.core_type<tc>, window_params = [{transform_indices = @transform_0, window_bounds = array<i64: 2, 3>}, {transform_indices = @transform_1, window_bounds = array<i64: 1, 8, 32>}, {transform_indices = @transform_2, window_bounds = array<i64: 1, 32, 128>}, {transform_indices = @transform_3, window_bounds = array<i64: 1, 64, 32>}, {transform_indices = @transform_4, window_bounds = array<i64: 1, 32, 64>}, {transform_indices = @transform_5, window_bounds = array<i64: 1, 64, 32>}, {transform_indices = @transform_6, window_bounds = array<i64: 1, 10, 64>}, {transform_indices = @transform_7, window_bounds = array<i64: 1, 1, 8, 32>}]} {
    %c0_i32 = arith.constant 0 : i32
    %0 = arith.cmpi eq, %arg1, %c0_i32 : i32
    %1 = arith.extui %0 : i1 to i32
    %c0_i32_0 = arith.constant 0 : i32
    %2 = arith.cmpi ne, %1, %c0_i32_0 : i32
    scf.if %2 {
      %c0_99 = arith.constant 0 : index
      %c0_100 = arith.constant 0 : index
      %c0_101 = arith.constant 0 : index
      %392 = vector.load %arg3[%c0_99, %c0_100, %c0_101] : memref<1x8x32xbf16, #tpu.memory_space<vmem>>, vector<1x8x32xbf16>
      %393 = vector.shape_cast %392 : vector<1x8x32xbf16> to vector<8x32xbf16>
      %394 = arith.extf %393 : vector<8x32xbf16> to vector<8x32xf32>
      %c0_102 = arith.constant 0 : index
      %c0_103 = arith.constant 0 : index
      %395 = vector.load %arg10[%c0_102, %c0_103] : memref<8x32xf32, #tpu.memory_space<vmem>>, vector<8x32xf32>
      tpu.vector_store %arg10[%c0_102, %c0_103], %394 {strides = array<i32>} : memref<8x32xf32, #tpu.memory_space<vmem>>, vector<8x32xf32>,
      %c0_104 = arith.constant 0 : index
      %c0_105 = arith.constant 0 : index
      %396 = vector.load %arg11[%c0_104, %c0_105] : memref<8x32xf32, #tpu.memory_space<vmem>>, vector<8x32xf32>
      tpu.vector_store %arg11[%c0_104, %c0_105], %394 {strides = array<i32>} : memref<8x32xf32, #tpu.memory_space<vmem>>, vector<8x32xf32>,
    } else {
    }
    %3 = arith.index_cast %arg1 : i32 to index
    %c0 = arith.constant 0 : index
    %4 = memref.load %arg2[%3, %c0] : memref<2x3xf32, #tpu.memory_space<smem>>
    %5 = arith.index_cast %arg1 : i32 to index
    %c1 = arith.constant 1 : index
    %6 = memref.load %arg2[%5, %c1] : memref<2x3xf32, #tpu.memory_space<smem>>
    %7 = arith.index_cast %arg1 : i32 to index
    %c2 = arith.constant 2 : index
    %8 = memref.load %arg2[%7, %c2] : memref<2x3xf32, #tpu.memory_space<smem>>
    %c0_1 = arith.constant 0 : index
    %c0_2 = arith.constant 0 : index
    %c0_3 = arith.constant 0 : index
    %9 = vector.load %arg8[%c0_1, %c0_2, %c0_3] : memref<1x10x64xf32, #tpu.memory_space<vmem>>, vector<1x10x64xf32>
    %10 = vector.shape_cast %9 : vector<1x10x64xf32> to vector<10x64xf32>
    %11 = vector.extract_strided_slice %10 {offsets = [0, 0], sizes = [1, 16], strides = [1, 1]} : vector<10x64xf32> to vector<1x16xf32>
    %12 = vector.extract_strided_slice %10 {offsets = [1, 0], sizes = [1, 16], strides = [1, 1]} : vector<10x64xf32> to vector<1x16xf32>
    %13 = vector.extract_strided_slice %10 {offsets = [2, 0], sizes = [1, 16], strides = [1, 1]} : vector<10x64xf32> to vector<1x16xf32>
    %14 = vector.extract_strided_slice %10 {offsets = [3, 0], sizes = [1, 16], strides = [1, 1]} : vector<10x64xf32> to vector<1x16xf32>
    %15 = vector.extract_strided_slice %10 {offsets = [4, 0], sizes = [1, 32], strides = [1, 1]} : vector<10x64xf32> to vector<1x32xf32>
    %16 = vector.extract_strided_slice %10 {offsets = [5, 0], sizes = [1, 32], strides = [1, 1]} : vector<10x64xf32> to vector<1x32xf32>
    %17 = vector.extract_strided_slice %10 {offsets = [6, 0], sizes = [1, 64], strides = [1, 1]} : vector<10x64xf32> to vector<1x64xf32>
    %18 = vector.extract_strided_slice %10 {offsets = [7, 0], sizes = [1, 32], strides = [1, 1]} : vector<10x64xf32> to vector<1x32xf32>
    %19 = vector.extract_strided_slice %10 {offsets = [8, 0], sizes = [1, 32], strides = [1, 1]} : vector<10x64xf32> to vector<1x32xf32>
    %20 = vector.extract_strided_slice %10 {offsets = [9, 0], sizes = [1, 32], strides = [1, 1]} : vector<10x64xf32> to vector<1x32xf32>
    %c0_4 = arith.constant 0 : index
    %c0_5 = arith.constant 0 : index
    %c0_6 = arith.constant 0 : index
    %21 = vector.load %arg4[%c0_4, %c0_5, %c0_6] : memref<1x32x128xbf16, #tpu.memory_space<vmem>>, vector<1x32x128xbf16>
    %22 = vector.shape_cast %21 : vector<1x32x128xbf16> to vector<32x128xbf16>
    %c0_7 = arith.constant 0 : index
    %c0_8 = arith.constant 0 : index
    %c0_9 = arith.constant 0 : index
    %23 = vector.load %arg5[%c0_7, %c0_8, %c0_9] : memref<1x64x32xbf16, #tpu.memory_space<vmem>>, vector<1x64x32xbf16>
    %24 = vector.shape_cast %23 : vector<1x64x32xbf16> to vector<64x32xbf16>
    %c0_10 = arith.constant 0 : index
    %c0_11 = arith.constant 0 : index
    %c0_12 = arith.constant 0 : index
    %25 = vector.load %arg6[%c0_10, %c0_11, %c0_12] : memref<1x32x64xbf16, #tpu.memory_space<vmem>>, vector<1x32x64xbf16>
    %26 = vector.shape_cast %25 : vector<1x32x64xbf16> to vector<32x64xbf16>
    %c0_13 = arith.constant 0 : index
    %c0_14 = arith.constant 0 : index
    %c0_15 = arith.constant 0 : index
    %27 = vector.load %arg7[%c0_13, %c0_14, %c0_15] : memref<1x64x32xbf16, #tpu.memory_space<vmem>>, vector<1x64x32xbf16>
    %28 = vector.shape_cast %27 : vector<1x64x32xbf16> to vector<64x32xbf16>
    %c0_16 = arith.constant 0 : index
    %c0_17 = arith.constant 0 : index
    %29 = vector.load %arg10[%c0_16, %c0_17] : memref<8x32xf32, #tpu.memory_space<vmem>>, vector<8x32xf32>
    %c0_18 = arith.constant 0 : index
    %c0_19 = arith.constant 0 : index
    %30 = vector.load %arg11[%c0_18, %c0_19] : memref<8x32xf32, #tpu.memory_space<vmem>>, vector<8x32xf32>
    %31 = arith.truncf %29 : vector<8x32xf32> to vector<8x32xbf16>
    %cst = arith.constant dense<0.000000e+00> : vector<8x128xf32>
    %32 = tpu.matmul %31, %22, %cst {dimension_numbers = #tpu.dot_dimension_numbers<[1], [0], [0], [1], [0, 0, 1, 1], [], []>} : vector<8x32xbf16>, vector<32x128xbf16>, vector<8x128xf32> -> vector<8x128xf32>
    %33 = vector.extract_strided_slice %32 {offsets = [0, 0], sizes = [8, 16], strides = [1, 1]} : vector<8x128xf32> to vector<8x16xf32>
    %34 = vector.extract_strided_slice %32 {offsets = [0, 16], sizes = [8, 64], strides = [1, 1]} : vector<8x128xf32> to vector<8x64xf32>
    %35 = arith.negf %34 : vector<8x64xf32>
    %36 = math.exp %35 : vector<8x64xf32>
    %cst_20 = arith.constant 1.000000e+00 : f32
    %37 = vector.broadcast %cst_20 : f32 to vector<8x64xf32>
    %38 = arith.addf %37, %36 : vector<8x64xf32>
    %39 = arith.divf %37, %38 : vector<8x64xf32>
    %40 = arith.mulf %34, %39 : vector<8x64xf32>
    %41 = vector.extract_strided_slice %32 {offsets = [0, 80], sizes = [8, 32], strides = [1, 1]} : vector<8x128xf32> to vector<8x32xf32>
    %42 = arith.negf %41 : vector<8x32xf32>
    %43 = math.exp %42 : vector<8x32xf32>
    %cst_21 = arith.constant 1.000000e+00 : f32
    %44 = vector.broadcast %cst_21 : f32 to vector<8x32xf32>
    %45 = arith.addf %44, %43 : vector<8x32xf32>
    %46 = arith.divf %44, %45 : vector<8x32xf32>
    %47 = vector.broadcast %11 : vector<1x16xf32> to vector<8x16xf32>
    %48 = arith.mulf %33, %47 : vector<8x16xf32>
    %49 = vector.broadcast %12 : vector<1x16xf32> to vector<8x16xf32>
    %50 = arith.addf %48, %49 : vector<8x16xf32>
    %51 = vector.broadcast %13 : vector<1x16xf32> to vector<8x16xf32>
    %52 = arith.mulf %33, %51 : vector<8x16xf32>
    %53 = vector.broadcast %14 : vector<1x16xf32> to vector<8x16xf32>
    %54 = arith.addf %52, %53 : vector<8x16xf32>
    %55 = arith.truncf %50 : vector<8x16xf32> to vector<8x16xbf16>
    %56 = arith.truncf %54 : vector<8x16xf32> to vector<8x16xbf16>
    %cst_22 = arith.constant dense<0.000000e+00> : vector<8x8xf32>
    %57 = tpu.matmul %55, %56, %cst_22 {dimension_numbers = #tpu.dot_dimension_numbers<[1], [1], [0], [0], [0, 0, 1, 0], [], []>} : vector<8x16xbf16>, vector<8x16xbf16>, vector<8x8xf32> -> vector<8x8xf32>
    %cst_23 = arith.constant 2.500000e-01 : f32
    %58 = vector.broadcast %cst_23 : f32 to vector<8x8xf32>
    %59 = arith.mulf %57, %58 : vector<8x8xf32>
    %cst_24 = arith.constant dense<0xFF800000> : vector<8xf32>
    %60 = vector.multi_reduction <maximumf>, %59, %cst_24 [1] : vector<8x8xf32> to vector<8xf32>
    %61 = vector.shape_cast %60 : vector<8xf32> to vector<8x1xf32>
    %62 = vector.broadcast %61 : vector<8x1xf32> to vector<8x8xf32>
    %63 = arith.subf %59, %62 : vector<8x8xf32>
    %64 = math.exp %63 : vector<8x8xf32>
    %cst_25 = arith.constant dense<0.000000e+00> : vector<8xf32>
    %65 = vector.multi_reduction <add>, %64, %cst_25 [1] : vector<8x8xf32> to vector<8xf32>
    %66 = vector.shape_cast %65 : vector<8xf32> to vector<8x1xf32>
    %67 = tpu.reciprocal %66 {approx = true} : vector<8x1xf32> -> vector<8x1xf32>
    %68 = vector.broadcast %67 : vector<8x1xf32> to vector<8x8xf32>
    %69 = arith.mulf %64, %68 : vector<8x8xf32>
    %70 = arith.truncf %69 : vector<8x8xf32> to vector<8x8xbf16>
    %71 = arith.truncf %40 : vector<8x64xf32> to vector<8x64xbf16>
    %cst_26 = arith.constant dense<0.000000e+00> : vector<8x64xf32>
    %72 = tpu.matmul %70, %71, %cst_26 {dimension_numbers = #tpu.dot_dimension_numbers<[1], [0], [0], [1], [0, 0, 1, 1], [], []>} : vector<8x8xbf16>, vector<8x64xbf16>, vector<8x64xf32> -> vector<8x64xf32>
    %73 = arith.truncf %72 : vector<8x64xf32> to vector<8x64xbf16>
    %cst_27 = arith.constant dense<0.000000e+00> : vector<8x32xf32>
    %74 = tpu.matmul %73, %24, %cst_27 {dimension_numbers = #tpu.dot_dimension_numbers<[1], [0], [0], [1], [0, 0, 1, 1], [], []>} : vector<8x64xbf16>, vector<64x32xbf16>, vector<8x32xf32> -> vector<8x32xf32>
    %75 = arith.negf %74 : vector<8x32xf32>
    %76 = math.exp %75 : vector<8x32xf32>
    %cst_28 = arith.constant 1.000000e+00 : f32
    %77 = vector.broadcast %cst_28 : f32 to vector<8x32xf32>
    %78 = arith.addf %77, %76 : vector<8x32xf32>
    %79 = arith.divf %77, %78 : vector<8x32xf32>
    %80 = arith.mulf %74, %79 : vector<8x32xf32>
    %81 = arith.mulf %46, %80 : vector<8x32xf32>
    %cst_29 = arith.constant 1.000000e+00 : f32
    %82 = vector.broadcast %cst_29 : f32 to vector<8x32xf32>
    %83 = arith.subf %82, %46 : vector<8x32xf32>
    %84 = arith.mulf %83, %29 : vector<8x32xf32>
    %85 = arith.addf %81, %84 : vector<8x32xf32>
    %cst_30 = arith.constant dense<0.000000e+00> : vector<8xf32>
    %86 = vector.multi_reduction <add>, %85, %cst_30 [1] : vector<8x32xf32> to vector<8xf32>
    %87 = vector.shape_cast %86 : vector<8xf32> to vector<8x1xf32>
    %cst_31 = arith.constant 3.200000e+01 : f32
    %88 = vector.broadcast %cst_31 : f32 to vector<8x1xf32>
    %89 = arith.divf %87, %88 : vector<8x1xf32>
    %90 = vector.broadcast %89 : vector<8x1xf32> to vector<8x32xf32>
    %91 = arith.subf %85, %90 : vector<8x32xf32>
    %92 = arith.mulf %91, %91 : vector<8x32xf32>
    %cst_32 = arith.constant dense<0.000000e+00> : vector<8xf32>
    %93 = vector.multi_reduction <add>, %92, %cst_32 [1] : vector<8x32xf32> to vector<8xf32>
    %94 = vector.shape_cast %93 : vector<8xf32> to vector<8x1xf32>
    %cst_33 = arith.constant 3.200000e+01 : f32
    %95 = vector.broadcast %cst_33 : f32 to vector<8x1xf32>
    %96 = arith.divf %94, %95 : vector<8x1xf32>
    %97 = vector.broadcast %89 : vector<8x1xf32> to vector<8x32xf32>
    %98 = arith.subf %85, %97 : vector<8x32xf32>
    %cst_34 = arith.constant 9.99999974E-6 : f32
    %99 = vector.broadcast %cst_34 : f32 to vector<8x1xf32>
    %100 = arith.addf %96, %99 : vector<8x1xf32>
    %101 = math.rsqrt %100 : vector<8x1xf32>
    %102 = vector.broadcast %101 : vector<8x1xf32> to vector<8x32xf32>
    %103 = arith.mulf %98, %102 : vector<8x32xf32>
    %104 = vector.broadcast %15 : vector<1x32xf32> to vector<8x32xf32>
    %105 = arith.mulf %103, %104 : vector<8x32xf32>
    %106 = vector.broadcast %16 : vector<1x32xf32> to vector<8x32xf32>
    %107 = arith.addf %105, %106 : vector<8x32xf32>
    %108 = arith.truncf %107 : vector<8x32xf32> to vector<8x32xbf16>
    %cst_35 = arith.constant dense<0.000000e+00> : vector<8x64xf32>
    %109 = tpu.matmul %108, %26, %cst_35 {dimension_numbers = #tpu.dot_dimension_numbers<[1], [0], [0], [1], [0, 0, 1, 1], [], []>} : vector<8x32xbf16>, vector<32x64xbf16>, vector<8x64xf32> -> vector<8x64xf32>
    %110 = vector.broadcast %17 : vector<1x64xf32> to vector<8x64xf32>
    %111 = arith.addf %109, %110 : vector<8x64xf32>
    %112 = arith.negf %111 : vector<8x64xf32>
    %113 = math.exp %112 : vector<8x64xf32>
    %cst_36 = arith.constant 1.000000e+00 : f32
    %114 = vector.broadcast %cst_36 : f32 to vector<8x64xf32>
    %115 = arith.addf %114, %113 : vector<8x64xf32>
    %116 = arith.divf %114, %115 : vector<8x64xf32>
    %117 = arith.mulf %111, %116 : vector<8x64xf32>
    %118 = arith.truncf %117 : vector<8x64xf32> to vector<8x64xbf16>
    %cst_37 = arith.constant dense<0.000000e+00> : vector<8x32xf32>
    %119 = tpu.matmul %118, %28, %cst_37 {dimension_numbers = #tpu.dot_dimension_numbers<[1], [0], [0], [1], [0, 0, 1, 1], [], []>} : vector<8x64xbf16>, vector<64x32xbf16>, vector<8x32xf32> -> vector<8x32xf32>
    %120 = vector.broadcast %18 : vector<1x32xf32> to vector<8x32xf32>
    %121 = arith.addf %119, %120 : vector<8x32xf32>
    %122 = arith.addf %107, %121 : vector<8x32xf32>
    %cst_38 = arith.constant dense<0.000000e+00> : vector<8xf32>
    %123 = vector.multi_reduction <add>, %122, %cst_38 [1] : vector<8x32xf32> to vector<8xf32>
    %124 = vector.shape_cast %123 : vector<8xf32> to vector<8x1xf32>
    %cst_39 = arith.constant 3.200000e+01 : f32
    %125 = vector.broadcast %cst_39 : f32 to vector<8x1xf32>
    %126 = arith.divf %124, %125 : vector<8x1xf32>
    %127 = vector.broadcast %126 : vector<8x1xf32> to vector<8x32xf32>
    %128 = arith.subf %122, %127 : vector<8x32xf32>
    %129 = arith.mulf %128, %128 : vector<8x32xf32>
    %cst_40 = arith.constant dense<0.000000e+00> : vector<8xf32>
    %130 = vector.multi_reduction <add>, %129, %cst_40 [1] : vector<8x32xf32> to vector<8xf32>
    %131 = vector.shape_cast %130 : vector<8xf32> to vector<8x1xf32>
    %cst_41 = arith.constant 3.200000e+01 : f32
    %132 = vector.broadcast %cst_41 : f32 to vector<8x1xf32>
    %133 = arith.divf %131, %132 : vector<8x1xf32>
    %134 = vector.broadcast %126 : vector<8x1xf32> to vector<8x32xf32>
    %135 = arith.subf %122, %134 : vector<8x32xf32>
    %cst_42 = arith.constant 9.99999974E-6 : f32
    %136 = vector.broadcast %cst_42 : f32 to vector<8x1xf32>
    %137 = arith.addf %133, %136 : vector<8x1xf32>
    %138 = math.rsqrt %137 : vector<8x1xf32>
    %139 = vector.broadcast %138 : vector<8x1xf32> to vector<8x32xf32>
    %140 = arith.mulf %135, %139 : vector<8x32xf32>
    %141 = vector.broadcast %19 : vector<1x32xf32> to vector<8x32xf32>
    %142 = arith.mulf %140, %141 : vector<8x32xf32>
    %143 = vector.broadcast %20 : vector<1x32xf32> to vector<8x32xf32>
    %144 = arith.addf %142, %143 : vector<8x32xf32>
    %145 = arith.addf %29, %144 : vector<8x32xf32>
    %146 = arith.truncf %145 : vector<8x32xf32> to vector<8x32xbf16>
    %cst_43 = arith.constant dense<0.000000e+00> : vector<8x128xf32>
    %147 = tpu.matmul %146, %22, %cst_43 {dimension_numbers = #tpu.dot_dimension_numbers<[1], [0], [0], [1], [0, 0, 1, 1], [], []>} : vector<8x32xbf16>, vector<32x128xbf16>, vector<8x128xf32> -> vector<8x128xf32>
    %148 = vector.extract_strided_slice %147 {offsets = [0, 0], sizes = [8, 16], strides = [1, 1]} : vector<8x128xf32> to vector<8x16xf32>
    %149 = vector.extract_strided_slice %147 {offsets = [0, 16], sizes = [8, 64], strides = [1, 1]} : vector<8x128xf32> to vector<8x64xf32>
    %150 = arith.negf %149 : vector<8x64xf32>
    %151 = math.exp %150 : vector<8x64xf32>
    %cst_44 = arith.constant 1.000000e+00 : f32
    %152 = vector.broadcast %cst_44 : f32 to vector<8x64xf32>
    %153 = arith.addf %152, %151 : vector<8x64xf32>
    %154 = arith.divf %152, %153 : vector<8x64xf32>
    %155 = arith.mulf %149, %154 : vector<8x64xf32>
    %156 = vector.extract_strided_slice %147 {offsets = [0, 80], sizes = [8, 32], strides = [1, 1]} : vector<8x128xf32> to vector<8x32xf32>
    %157 = arith.negf %156 : vector<8x32xf32>
    %158 = math.exp %157 : vector<8x32xf32>
    %cst_45 = arith.constant 1.000000e+00 : f32
    %159 = vector.broadcast %cst_45 : f32 to vector<8x32xf32>
    %160 = arith.addf %159, %158 : vector<8x32xf32>
    %161 = arith.divf %159, %160 : vector<8x32xf32>
    %162 = vector.broadcast %11 : vector<1x16xf32> to vector<8x16xf32>
    %163 = arith.mulf %148, %162 : vector<8x16xf32>
    %164 = vector.broadcast %12 : vector<1x16xf32> to vector<8x16xf32>
    %165 = arith.addf %163, %164 : vector<8x16xf32>
    %166 = vector.broadcast %13 : vector<1x16xf32> to vector<8x16xf32>
    %167 = arith.mulf %148, %166 : vector<8x16xf32>
    %168 = vector.broadcast %14 : vector<1x16xf32> to vector<8x16xf32>
    %169 = arith.addf %167, %168 : vector<8x16xf32>
    %170 = arith.truncf %165 : vector<8x16xf32> to vector<8x16xbf16>
    %171 = arith.truncf %169 : vector<8x16xf32> to vector<8x16xbf16>
    %cst_46 = arith.constant dense<0.000000e+00> : vector<8x8xf32>
    %172 = tpu.matmul %170, %171, %cst_46 {dimension_numbers = #tpu.dot_dimension_numbers<[1], [1], [0], [0], [0, 0, 1, 0], [], []>} : vector<8x16xbf16>, vector<8x16xbf16>, vector<8x8xf32> -> vector<8x8xf32>
    %cst_47 = arith.constant 2.500000e-01 : f32
    %173 = vector.broadcast %cst_47 : f32 to vector<8x8xf32>
    %174 = arith.mulf %172, %173 : vector<8x8xf32>
    %cst_48 = arith.constant dense<0xFF800000> : vector<8xf32>
    %175 = vector.multi_reduction <maximumf>, %174, %cst_48 [1] : vector<8x8xf32> to vector<8xf32>
    %176 = vector.shape_cast %175 : vector<8xf32> to vector<8x1xf32>
    %177 = vector.broadcast %176 : vector<8x1xf32> to vector<8x8xf32>
    %178 = arith.subf %174, %177 : vector<8x8xf32>
    %179 = math.exp %178 : vector<8x8xf32>
    %cst_49 = arith.constant dense<0.000000e+00> : vector<8xf32>
    %180 = vector.multi_reduction <add>, %179, %cst_49 [1] : vector<8x8xf32> to vector<8xf32>
    %181 = vector.shape_cast %180 : vector<8xf32> to vector<8x1xf32>
    %182 = tpu.reciprocal %181 {approx = true} : vector<8x1xf32> -> vector<8x1xf32>
    %183 = vector.broadcast %182 : vector<8x1xf32> to vector<8x8xf32>
    %184 = arith.mulf %179, %183 : vector<8x8xf32>
    %185 = arith.truncf %184 : vector<8x8xf32> to vector<8x8xbf16>
    %186 = arith.truncf %155 : vector<8x64xf32> to vector<8x64xbf16>
    %cst_50 = arith.constant dense<0.000000e+00> : vector<8x64xf32>
    %187 = tpu.matmul %185, %186, %cst_50 {dimension_numbers = #tpu.dot_dimension_numbers<[1], [0], [0], [1], [0, 0, 1, 1], [], []>} : vector<8x8xbf16>, vector<8x64xbf16>, vector<8x64xf32> -> vector<8x64xf32>
    %188 = arith.truncf %187 : vector<8x64xf32> to vector<8x64xbf16>
    %cst_51 = arith.constant dense<0.000000e+00> : vector<8x32xf32>
    %189 = tpu.matmul %188, %24, %cst_51 {dimension_numbers = #tpu.dot_dimension_numbers<[1], [0], [0], [1], [0, 0, 1, 1], [], []>} : vector<8x64xbf16>, vector<64x32xbf16>, vector<8x32xf32> -> vector<8x32xf32>
    %190 = arith.negf %189 : vector<8x32xf32>
    %191 = math.exp %190 : vector<8x32xf32>
    %cst_52 = arith.constant 1.000000e+00 : f32
    %192 = vector.broadcast %cst_52 : f32 to vector<8x32xf32>
    %193 = arith.addf %192, %191 : vector<8x32xf32>
    %194 = arith.divf %192, %193 : vector<8x32xf32>
    %195 = arith.mulf %189, %194 : vector<8x32xf32>
    %196 = arith.mulf %161, %195 : vector<8x32xf32>
    %cst_53 = arith.constant 1.000000e+00 : f32
    %197 = vector.broadcast %cst_53 : f32 to vector<8x32xf32>
    %198 = arith.subf %197, %161 : vector<8x32xf32>
    %199 = arith.mulf %198, %145 : vector<8x32xf32>
    %200 = arith.addf %196, %199 : vector<8x32xf32>
    %cst_54 = arith.constant dense<0.000000e+00> : vector<8xf32>
    %201 = vector.multi_reduction <add>, %200, %cst_54 [1] : vector<8x32xf32> to vector<8xf32>
    %202 = vector.shape_cast %201 : vector<8xf32> to vector<8x1xf32>
    %cst_55 = arith.constant 3.200000e+01 : f32
    %203 = vector.broadcast %cst_55 : f32 to vector<8x1xf32>
    %204 = arith.divf %202, %203 : vector<8x1xf32>
    %205 = vector.broadcast %204 : vector<8x1xf32> to vector<8x32xf32>
    %206 = arith.subf %200, %205 : vector<8x32xf32>
    %207 = arith.mulf %206, %206 : vector<8x32xf32>
    %cst_56 = arith.constant dense<0.000000e+00> : vector<8xf32>
    %208 = vector.multi_reduction <add>, %207, %cst_56 [1] : vector<8x32xf32> to vector<8xf32>
    %209 = vector.shape_cast %208 : vector<8xf32> to vector<8x1xf32>
    %cst_57 = arith.constant 3.200000e+01 : f32
    %210 = vector.broadcast %cst_57 : f32 to vector<8x1xf32>
    %211 = arith.divf %209, %210 : vector<8x1xf32>
    %212 = vector.broadcast %204 : vector<8x1xf32> to vector<8x32xf32>
    %213 = arith.subf %200, %212 : vector<8x32xf32>
    %cst_58 = arith.constant 9.99999974E-6 : f32
    %214 = vector.broadcast %cst_58 : f32 to vector<8x1xf32>
    %215 = arith.addf %211, %214 : vector<8x1xf32>
    %216 = math.rsqrt %215 : vector<8x1xf32>
    %217 = vector.broadcast %216 : vector<8x1xf32> to vector<8x32xf32>
    %218 = arith.mulf %213, %217 : vector<8x32xf32>
    %219 = vector.broadcast %15 : vector<1x32xf32> to vector<8x32xf32>
    %220 = arith.mulf %218, %219 : vector<8x32xf32>
    %221 = vector.broadcast %16 : vector<1x32xf32> to vector<8x32xf32>
    %222 = arith.addf %220, %221 : vector<8x32xf32>
    %223 = arith.truncf %222 : vector<8x32xf32> to vector<8x32xbf16>
    %cst_59 = arith.constant dense<0.000000e+00> : vector<8x64xf32>
    %224 = tpu.matmul %223, %26, %cst_59 {dimension_numbers = #tpu.dot_dimension_numbers<[1], [0], [0], [1], [0, 0, 1, 1], [], []>} : vector<8x32xbf16>, vector<32x64xbf16>, vector<8x64xf32> -> vector<8x64xf32>
    %225 = vector.broadcast %17 : vector<1x64xf32> to vector<8x64xf32>
    %226 = arith.addf %224, %225 : vector<8x64xf32>
    %227 = arith.negf %226 : vector<8x64xf32>
    %228 = math.exp %227 : vector<8x64xf32>
    %cst_60 = arith.constant 1.000000e+00 : f32
    %229 = vector.broadcast %cst_60 : f32 to vector<8x64xf32>
    %230 = arith.addf %229, %228 : vector<8x64xf32>
    %231 = arith.divf %229, %230 : vector<8x64xf32>
    %232 = arith.mulf %226, %231 : vector<8x64xf32>
    %233 = arith.truncf %232 : vector<8x64xf32> to vector<8x64xbf16>
    %cst_61 = arith.constant dense<0.000000e+00> : vector<8x32xf32>
    %234 = tpu.matmul %233, %28, %cst_61 {dimension_numbers = #tpu.dot_dimension_numbers<[1], [0], [0], [1], [0, 0, 1, 1], [], []>} : vector<8x64xbf16>, vector<64x32xbf16>, vector<8x32xf32> -> vector<8x32xf32>
    %235 = vector.broadcast %18 : vector<1x32xf32> to vector<8x32xf32>
    %236 = arith.addf %234, %235 : vector<8x32xf32>
    %237 = arith.addf %222, %236 : vector<8x32xf32>
    %cst_62 = arith.constant dense<0.000000e+00> : vector<8xf32>
    %238 = vector.multi_reduction <add>, %237, %cst_62 [1] : vector<8x32xf32> to vector<8xf32>
    %239 = vector.shape_cast %238 : vector<8xf32> to vector<8x1xf32>
    %cst_63 = arith.constant 3.200000e+01 : f32
    %240 = vector.broadcast %cst_63 : f32 to vector<8x1xf32>
    %241 = arith.divf %239, %240 : vector<8x1xf32>
    %242 = vector.broadcast %241 : vector<8x1xf32> to vector<8x32xf32>
    %243 = arith.subf %237, %242 : vector<8x32xf32>
    %244 = arith.mulf %243, %243 : vector<8x32xf32>
    %cst_64 = arith.constant dense<0.000000e+00> : vector<8xf32>
    %245 = vector.multi_reduction <add>, %244, %cst_64 [1] : vector<8x32xf32> to vector<8xf32>
    %246 = vector.shape_cast %245 : vector<8xf32> to vector<8x1xf32>
    %cst_65 = arith.constant 3.200000e+01 : f32
    %247 = vector.broadcast %cst_65 : f32 to vector<8x1xf32>
    %248 = arith.divf %246, %247 : vector<8x1xf32>
    %249 = vector.broadcast %241 : vector<8x1xf32> to vector<8x32xf32>
    %250 = arith.subf %237, %249 : vector<8x32xf32>
    %cst_66 = arith.constant 9.99999974E-6 : f32
    %251 = vector.broadcast %cst_66 : f32 to vector<8x1xf32>
    %252 = arith.addf %248, %251 : vector<8x1xf32>
    %253 = math.rsqrt %252 : vector<8x1xf32>
    %254 = vector.broadcast %253 : vector<8x1xf32> to vector<8x32xf32>
    %255 = arith.mulf %250, %254 : vector<8x32xf32>
    %256 = vector.broadcast %19 : vector<1x32xf32> to vector<8x32xf32>
    %257 = arith.mulf %255, %256 : vector<8x32xf32>
    %258 = vector.broadcast %20 : vector<1x32xf32> to vector<8x32xf32>
    %259 = arith.addf %257, %258 : vector<8x32xf32>
    %260 = vector.broadcast %4 : f32 to vector<8x32xf32>
    %261 = arith.mulf %260, %144 : vector<8x32xf32>
    %262 = arith.addf %29, %261 : vector<8x32xf32>
    %263 = vector.broadcast %6 : f32 to vector<8x32xf32>
    %264 = arith.mulf %263, %259 : vector<8x32xf32>
    %265 = arith.addf %262, %264 : vector<8x32xf32>
    %266 = arith.addf %30, %265 : vector<8x32xf32>
    %267 = vector.broadcast %8 : f32 to vector<8x32xf32>
    %268 = arith.mulf %266, %267 : vector<8x32xf32>
    %269 = arith.truncf %268 : vector<8x32xf32> to vector<8x32xbf16>
    %cst_67 = arith.constant dense<0.000000e+00> : vector<8x128xf32>
    %270 = tpu.matmul %269, %22, %cst_67 {dimension_numbers = #tpu.dot_dimension_numbers<[1], [0], [0], [1], [0, 0, 1, 1], [], []>} : vector<8x32xbf16>, vector<32x128xbf16>, vector<8x128xf32> -> vector<8x128xf32>
    %271 = vector.extract_strided_slice %270 {offsets = [0, 0], sizes = [8, 16], strides = [1, 1]} : vector<8x128xf32> to vector<8x16xf32>
    %272 = vector.extract_strided_slice %270 {offsets = [0, 16], sizes = [8, 64], strides = [1, 1]} : vector<8x128xf32> to vector<8x64xf32>
    %273 = arith.negf %272 : vector<8x64xf32>
    %274 = math.exp %273 : vector<8x64xf32>
    %cst_68 = arith.constant 1.000000e+00 : f32
    %275 = vector.broadcast %cst_68 : f32 to vector<8x64xf32>
    %276 = arith.addf %275, %274 : vector<8x64xf32>
    %277 = arith.divf %275, %276 : vector<8x64xf32>
    %278 = arith.mulf %272, %277 : vector<8x64xf32>
    %279 = vector.extract_strided_slice %270 {offsets = [0, 80], sizes = [8, 32], strides = [1, 1]} : vector<8x128xf32> to vector<8x32xf32>
    %280 = arith.negf %279 : vector<8x32xf32>
    %281 = math.exp %280 : vector<8x32xf32>
    %cst_69 = arith.constant 1.000000e+00 : f32
    %282 = vector.broadcast %cst_69 : f32 to vector<8x32xf32>
    %283 = arith.addf %282, %281 : vector<8x32xf32>
    %284 = arith.divf %282, %283 : vector<8x32xf32>
    %285 = vector.broadcast %11 : vector<1x16xf32> to vector<8x16xf32>
    %286 = arith.mulf %271, %285 : vector<8x16xf32>
    %287 = vector.broadcast %12 : vector<1x16xf32> to vector<8x16xf32>
    %288 = arith.addf %286, %287 : vector<8x16xf32>
    %289 = vector.broadcast %13 : vector<1x16xf32> to vector<8x16xf32>
    %290 = arith.mulf %271, %289 : vector<8x16xf32>
    %291 = vector.broadcast %14 : vector<1x16xf32> to vector<8x16xf32>
    %292 = arith.addf %290, %291 : vector<8x16xf32>
    %293 = arith.truncf %288 : vector<8x16xf32> to vector<8x16xbf16>
    %294 = arith.truncf %292 : vector<8x16xf32> to vector<8x16xbf16>
    %cst_70 = arith.constant dense<0.000000e+00> : vector<8x8xf32>
    %295 = tpu.matmul %293, %294, %cst_70 {dimension_numbers = #tpu.dot_dimension_numbers<[1], [1], [0], [0], [0, 0, 1, 0], [], []>} : vector<8x16xbf16>, vector<8x16xbf16>, vector<8x8xf32> -> vector<8x8xf32>
    %cst_71 = arith.constant 2.500000e-01 : f32
    %296 = vector.broadcast %cst_71 : f32 to vector<8x8xf32>
    %297 = arith.mulf %295, %296 : vector<8x8xf32>
    %cst_72 = arith.constant dense<0xFF800000> : vector<8xf32>
    %298 = vector.multi_reduction <maximumf>, %297, %cst_72 [1] : vector<8x8xf32> to vector<8xf32>
    %299 = vector.shape_cast %298 : vector<8xf32> to vector<8x1xf32>
    %300 = vector.broadcast %299 : vector<8x1xf32> to vector<8x8xf32>
    %301 = arith.subf %297, %300 : vector<8x8xf32>
    %302 = math.exp %301 : vector<8x8xf32>
    %cst_73 = arith.constant dense<0.000000e+00> : vector<8xf32>
    %303 = vector.multi_reduction <add>, %302, %cst_73 [1] : vector<8x8xf32> to vector<8xf32>
    %304 = vector.shape_cast %303 : vector<8xf32> to vector<8x1xf32>
    %305 = tpu.reciprocal %304 {approx = true} : vector<8x1xf32> -> vector<8x1xf32>
    %306 = vector.broadcast %305 : vector<8x1xf32> to vector<8x8xf32>
    %307 = arith.mulf %302, %306 : vector<8x8xf32>
    %308 = arith.truncf %307 : vector<8x8xf32> to vector<8x8xbf16>
    %309 = arith.truncf %278 : vector<8x64xf32> to vector<8x64xbf16>
    %cst_74 = arith.constant dense<0.000000e+00> : vector<8x64xf32>
    %310 = tpu.matmul %308, %309, %cst_74 {dimension_numbers = #tpu.dot_dimension_numbers<[1], [0], [0], [1], [0, 0, 1, 1], [], []>} : vector<8x8xbf16>, vector<8x64xbf16>, vector<8x64xf32> -> vector<8x64xf32>
    %311 = arith.truncf %310 : vector<8x64xf32> to vector<8x64xbf16>
    %cst_75 = arith.constant dense<0.000000e+00> : vector<8x32xf32>
    %312 = tpu.matmul %311, %24, %cst_75 {dimension_numbers = #tpu.dot_dimension_numbers<[1], [0], [0], [1], [0, 0, 1, 1], [], []>} : vector<8x64xbf16>, vector<64x32xbf16>, vector<8x32xf32> -> vector<8x32xf32>
    %313 = arith.negf %312 : vector<8x32xf32>
    %314 = math.exp %313 : vector<8x32xf32>
    %cst_76 = arith.constant 1.000000e+00 : f32
    %315 = vector.broadcast %cst_76 : f32 to vector<8x32xf32>
    %316 = arith.addf %315, %314 : vector<8x32xf32>
    %317 = arith.divf %315, %316 : vector<8x32xf32>
    %318 = arith.mulf %312, %317 : vector<8x32xf32>
    %319 = arith.mulf %284, %318 : vector<8x32xf32>
    %cst_77 = arith.constant 1.000000e+00 : f32
    %320 = vector.broadcast %cst_77 : f32 to vector<8x32xf32>
    %321 = arith.subf %320, %284 : vector<8x32xf32>
    %322 = arith.mulf %321, %268 : vector<8x32xf32>
    %323 = arith.addf %319, %322 : vector<8x32xf32>
    %cst_78 = arith.constant dense<0.000000e+00> : vector<8xf32>
    %324 = vector.multi_reduction <add>, %323, %cst_78 [1] : vector<8x32xf32> to vector<8xf32>
    %325 = vector.shape_cast %324 : vector<8xf32> to vector<8x1xf32>
    %cst_79 = arith.constant 3.200000e+01 : f32
    %326 = vector.broadcast %cst_79 : f32 to vector<8x1xf32>
    %327 = arith.divf %325, %326 : vector<8x1xf32>
    %328 = vector.broadcast %327 : vector<8x1xf32> to vector<8x32xf32>
    %329 = arith.subf %323, %328 : vector<8x32xf32>
    %330 = arith.mulf %329, %329 : vector<8x32xf32>
    %cst_80 = arith.constant dense<0.000000e+00> : vector<8xf32>
    %331 = vector.multi_reduction <add>, %330, %cst_80 [1] : vector<8x32xf32> to vector<8xf32>
    %332 = vector.shape_cast %331 : vector<8xf32> to vector<8x1xf32>
    %cst_81 = arith.constant 3.200000e+01 : f32
    %333 = vector.broadcast %cst_81 : f32 to vector<8x1xf32>
    %334 = arith.divf %332, %333 : vector<8x1xf32>
    %335 = vector.broadcast %327 : vector<8x1xf32> to vector<8x32xf32>
    %336 = arith.subf %323, %335 : vector<8x32xf32>
    %cst_82 = arith.constant 9.99999974E-6 : f32
    %337 = vector.broadcast %cst_82 : f32 to vector<8x1xf32>
    %338 = arith.addf %334, %337 : vector<8x1xf32>
    %339 = math.rsqrt %338 : vector<8x1xf32>
    %340 = vector.broadcast %339 : vector<8x1xf32> to vector<8x32xf32>
    %341 = arith.mulf %336, %340 : vector<8x32xf32>
    %342 = vector.broadcast %15 : vector<1x32xf32> to vector<8x32xf32>
    %343 = arith.mulf %341, %342 : vector<8x32xf32>
    %344 = vector.broadcast %16 : vector<1x32xf32> to vector<8x32xf32>
    %345 = arith.addf %343, %344 : vector<8x32xf32>
    %346 = arith.truncf %345 : vector<8x32xf32> to vector<8x32xbf16>
    %cst_83 = arith.constant dense<0.000000e+00> : vector<8x64xf32>
    %347 = tpu.matmul %346, %26, %cst_83 {dimension_numbers = #tpu.dot_dimension_numbers<[1], [0], [0], [1], [0, 0, 1, 1], [], []>} : vector<8x32xbf16>, vector<32x64xbf16>, vector<8x64xf32> -> vector<8x64xf32>
    %348 = vector.broadcast %17 : vector<1x64xf32> to vector<8x64xf32>
    %349 = arith.addf %347, %348 : vector<8x64xf32>
    %350 = arith.negf %349 : vector<8x64xf32>
    %351 = math.exp %350 : vector<8x64xf32>
    %cst_84 = arith.constant 1.000000e+00 : f32
    %352 = vector.broadcast %cst_84 : f32 to vector<8x64xf32>
    %353 = arith.addf %352, %351 : vector<8x64xf32>
    %354 = arith.divf %352, %353 : vector<8x64xf32>
    %355 = arith.mulf %349, %354 : vector<8x64xf32>
    %356 = arith.truncf %355 : vector<8x64xf32> to vector<8x64xbf16>
    %cst_85 = arith.constant dense<0.000000e+00> : vector<8x32xf32>
    %357 = tpu.matmul %356, %28, %cst_85 {dimension_numbers = #tpu.dot_dimension_numbers<[1], [0], [0], [1], [0, 0, 1, 1], [], []>} : vector<8x64xbf16>, vector<64x32xbf16>, vector<8x32xf32> -> vector<8x32xf32>
    %358 = vector.broadcast %18 : vector<1x32xf32> to vector<8x32xf32>
    %359 = arith.addf %357, %358 : vector<8x32xf32>
    %360 = arith.addf %345, %359 : vector<8x32xf32>
    %cst_86 = arith.constant dense<0.000000e+00> : vector<8xf32>
    %361 = vector.multi_reduction <add>, %360, %cst_86 [1] : vector<8x32xf32> to vector<8xf32>
    %362 = vector.shape_cast %361 : vector<8xf32> to vector<8x1xf32>
    %cst_87 = arith.constant 3.200000e+01 : f32
    %363 = vector.broadcast %cst_87 : f32 to vector<8x1xf32>
    %364 = arith.divf %362, %363 : vector<8x1xf32>
    %365 = vector.broadcast %364 : vector<8x1xf32> to vector<8x32xf32>
    %366 = arith.subf %360, %365 : vector<8x32xf32>
    %367 = arith.mulf %366, %366 : vector<8x32xf32>
    %cst_88 = arith.constant dense<0.000000e+00> : vector<8xf32>
    %368 = vector.multi_reduction <add>, %367, %cst_88 [1] : vector<8x32xf32> to vector<8xf32>
    %369 = vector.shape_cast %368 : vector<8xf32> to vector<8x1xf32>
    %cst_89 = arith.constant 3.200000e+01 : f32
    %370 = vector.broadcast %cst_89 : f32 to vector<8x1xf32>
    %371 = arith.divf %369, %370 : vector<8x1xf32>
    %372 = vector.broadcast %364 : vector<8x1xf32> to vector<8x32xf32>
    %373 = arith.subf %360, %372 : vector<8x32xf32>
    %cst_90 = arith.constant 9.99999974E-6 : f32
    %374 = vector.broadcast %cst_90 : f32 to vector<8x1xf32>
    %375 = arith.addf %371, %374 : vector<8x1xf32>
    %376 = math.rsqrt %375 : vector<8x1xf32>
    %377 = vector.broadcast %376 : vector<8x1xf32> to vector<8x32xf32>
    %378 = arith.mulf %373, %377 : vector<8x32xf32>
    %379 = vector.broadcast %19 : vector<1x32xf32> to vector<8x32xf32>
    %380 = arith.mulf %378, %379 : vector<8x32xf32>
    %381 = vector.broadcast %20 : vector<1x32xf32> to vector<8x32xf32>
    %382 = arith.addf %380, %381 : vector<8x32xf32>
    %383 = arith.subf %382, %265 : vector<8x32xf32>
    %384 = arith.addf %266, %383 : vector<8x32xf32>
    %385 = vector.broadcast %8 : f32 to vector<8x32xf32>
    %386 = arith.mulf %384, %385 : vector<8x32xf32>
    %c0_91 = arith.constant 0 : index
    %c0_92 = arith.constant 0 : index
    %387 = vector.load %arg10[%c0_91, %c0_92] : memref<8x32xf32, #tpu.memory_space<vmem>>, vector<8x32xf32>
    tpu.vector_store %arg10[%c0_91, %c0_92], %386 {strides = array<i32>} : memref<8x32xf32, #tpu.memory_space<vmem>>, vector<8x32xf32>,
    %c0_93 = arith.constant 0 : index
    %c0_94 = arith.constant 0 : index
    %388 = vector.load %arg11[%c0_93, %c0_94] : memref<8x32xf32, #tpu.memory_space<vmem>>, vector<8x32xf32>
    tpu.vector_store %arg11[%c0_93, %c0_94], %384 {strides = array<i32>} : memref<8x32xf32, #tpu.memory_space<vmem>>, vector<8x32xf32>,
    %389 = vector.shape_cast %386 : vector<8x32xf32> to vector<1x1x8x32xf32>
    %390 = arith.truncf %389 : vector<1x1x8x32xf32> to vector<1x1x8x32xbf16>
    %c0_95 = arith.constant 0 : index
    %c0_96 = arith.constant 0 : index
    %c0_97 = arith.constant 0 : index
    %c0_98 = arith.constant 0 : index
    %391 = vector.load %arg9[%c0_95, %c0_96, %c0_97, %c0_98] : memref<1x1x8x32xbf16, #tpu.memory_space<vmem>>, vector<1x1x8x32xbf16>
    tpu.vector_store %arg9[%c0_95, %c0_96, %c0_97, %c0_98], %390 {strides = array<i32>} : memref<1x1x8x32xbf16, #tpu.memory_space<vmem>>, vector<1x1x8x32xbf16>,
    return
  }
  func.func @transform_0(%arg0: i32, %arg1: i32) -> (i32, i32) {
    %c0_i32 = arith.constant 0 : i32
    %c0_i32_0 = arith.constant 0 : i32
    %c0_i32_1 = arith.constant 0 : i32
    return %c0_i32, %c0_i32_0 : i32, i32
  }
  func.func @transform_1(%arg0: i32, %arg1: i32) -> (i32, i32, i32) {
    %c0_i32 = arith.constant 0 : i32
    %c0_i32_0 = arith.constant 0 : i32
    %c0_i32_1 = arith.constant 0 : i32
    return %arg0, %c0_i32, %c0_i32_0 : i32, i32, i32
  }
  func.func @transform_2(%arg0: i32, %arg1: i32) -> (i32, i32, i32) {
    %c0_i32 = arith.constant 0 : i32
    %c0_i32_0 = arith.constant 0 : i32
    %c0_i32_1 = arith.constant 0 : i32
    return %arg1, %c0_i32, %c0_i32_0 : i32, i32, i32
  }
  func.func @transform_3(%arg0: i32, %arg1: i32) -> (i32, i32, i32) {
    %c0_i32 = arith.constant 0 : i32
    %c0_i32_0 = arith.constant 0 : i32
    %c0_i32_1 = arith.constant 0 : i32
    return %arg1, %c0_i32, %c0_i32_0 : i32, i32, i32
  }
  func.func @transform_4(%arg0: i32, %arg1: i32) -> (i32, i32, i32) {
    %c0_i32 = arith.constant 0 : i32
    %c0_i32_0 = arith.constant 0 : i32
    %c0_i32_1 = arith.constant 0 : i32
    return %arg1, %c0_i32, %c0_i32_0 : i32, i32, i32
  }
  func.func @transform_5(%arg0: i32, %arg1: i32) -> (i32, i32, i32) {
    %c0_i32 = arith.constant 0 : i32
    %c0_i32_0 = arith.constant 0 : i32
    %c0_i32_1 = arith.constant 0 : i32
    return %arg1, %c0_i32, %c0_i32_0 : i32, i32, i32
  }
  func.func @transform_6(%arg0: i32, %arg1: i32) -> (i32, i32, i32) {
    %c0_i32 = arith.constant 0 : i32
    %c0_i32_0 = arith.constant 0 : i32
    %c0_i32_1 = arith.constant 0 : i32
    return %arg1, %c0_i32, %c0_i32_0 : i32, i32, i32
  }
  func.func @transform_7(%arg0: i32, %arg1: i32) -> (i32, i32, i32, i32) {
    %c0_i32 = arith.constant 0 : i32
    %c0_i32_0 = arith.constant 0 : i32
    %c0_i32_1 = arith.constant 0 : i32
    return %arg1, %arg0, %c0_i32, %c0_i32_0 : i32, i32, i32, i32
  }
}

</mosaic_0001>

<bundles_post_ra>
// kernel: tpu_custom_call.1
= control target key start
LH: loop header
LB: loop body
LE: loop exit
PB: predicated region body
PF: predicated region fallthrough
CT: control target
= control target key end

     0   :  { %s3037_s0 = inlined_call_operand.vmem [shape: f32[2,3], index: 0, kind: input, shape index: {}]   ;;  %s3038_s1 = inlined_call_operand.vmem [shape: bf16[2,8,32], index: 1, kind: input, shape index: {}]   ;;  %s3039_s2 = inlined_call_operand.vmem [shape: bf16[2,32,128], index: 2, kind: input, shape index: {}]   ;;  %s3040_s3 = inlined_call_operand.vmem [shape: bf16[2,64,32], index: 3, kind: input, shape index: {}]   ;;  %s3041_s4 = inlined_call_operand.vmem [shape: bf16[2,32,64], index: 4, kind: input, shape index: {}]   ;;  %s3042_s5 = inlined_call_operand.vmem [shape: bf16[2,64,32], index: 5, kind: input, shape index: {}]   ;;  %s3043_s6 = inlined_call_operand.vmem [shape: f32[2,10,64], index: 6, kind: input, shape index: {}]   ;;  %s3044_s7 = inlined_call_operand.hbm [shape: bf16[2,2,8,32], index: 7, kind: output, shape index: {}]  }
   0x1   :  { %3053 = sst [smem:[#allocation18_spill]] %s3037_s0 }
   0x2   :  { %12 = vsyncpa [#allocation6], 0 }
   0x3   :  { %13 = vsyncpa [#allocation5], 0 }
   0x4   :  { %15 = vsyncpa [#allocation5 + $0x1], 0  ;;  %s2517_s24 = smov 0   ;;  %s2519_s25 = smov 0  }
   0x5   :  { %s2521_s26 = smov 0   ;;  %s2523_s27 = smov 0  }
   0x6   :  { %s2525_s28 = smov 0   ;;  %s2527_s29 = smov 0  }
   0x7   :  { %s2529_s30 = smov 0   ;;  %s2531_s8 = smov 0  }
   0x8 LB: > { %3054 = sst [smem:[#allocation10_spill]] %s2440_s24  ;;  %s1912_s9 = sadd.s32 4294967295, %s2468_s8   ;;  %s2468_s8 = sphi %s2531_s8, %s21_s8   ;;  %s2464_s30 = sphi %s2529_s30, %s3076_s30   ;;  %s2460_s29 = sphi %s2527_s29, %s3075_s29   ;;  %s2456_s28 = sphi %s2525_s28, %s3074_s28   ;;  %s2452_s27 = sphi %s2523_s27, %s3073_s27   ;;  %s2448_s26 = sphi %s2521_s26, %s3072_s26   ;;  %s2444_s25 = sphi %s2519_s25, %s3078_s25   ;;  %s2440_s24 = sphi %s2517_s24, %s3077_s24  }
   0x9   : > { %3055 = sst [smem:[#allocation11_spill]] %s2448_s26  ;;  %s1913_s10 = sadd.s32 4294967294, %s2468_s8  }
   0xa   : > { %3056 = sst [smem:[#allocation12_spill]] %s2460_s29  ;;  %s30_s11 = sadd.s32 1, %s2460_s29 }
   0xb   : > { %3057 = sst [smem:[#allocation13_spill]] %s2464_s30  ;;  %s33_s12 = sadd.s32 1, %s2464_s30 }
   0xc   : > { %p31_p0 = scmp.ge.s32.totalorder %s30_s11, 2  ;;  %s219_s13 = sadd.s32 1, %s2448_s26 }
   0xd   : > { %p229_p1 = scmp.ne.s32.totalorder %s2448_s26, %s2444_s25  ;;  %p230_p2 = scmp.eq.s32.totalorder %s1912_s9, 3 }
   0xe   : > { %s3080_s11 = smov (%p31_p0, %s30_s11), 0  ;;  %s3082_s12 = smov (!%p31_p0, %s33_s12), %s2464_s30 }
   0xf   : > { %3058 = sst [smem:[#allocation14_spill]] %s3080_s11  ;;  %s214_s14 = ssub.s32 %s2460_s29, %s3080_s11 }
  0x10   : > { %p2569_p3 = por %p230_p2, %p229_p1  ;;  %p35_p4 = scmp.ge.s32.totalorder %s3082_s12, 2 }
  0x11   : > { %p235_p5 = scmp.ne.s32.totalorder %s2444_s25, %s2440_s24  ;;  %p236_p6 = scmp.eq.s32.totalorder %s1913_s10, 3 }
  0x12   : > { %p1914_p7 = scmp.ge.s32.totalorder %s2468_s8, 1  ;;  %s3084_s12 = smov (%p35_p4, %s3082_s12), 0 }
  0x13   : > { %3060 = sst [smem:[#allocation15_spill]] %s3084_s12  ;;  %p2578_p8 = por %p236_p6, %p235_p5 }
  0x14   : > { %p243_p9 = scmp.lt.s32.totalorder %s2468_s8, 5  ;;  %s215_s17 = ssub.s32 %s2464_s30, %s3084_s12 }
  0x15   : > { %s3061_s16 = scalar_select %p2578_p8, 1, 0 }
  0x16   : > { %s216_s18 = sor.u32 %s215_s17, %s214_s14  ;;  %p2585_p10 = pnand %p1914_p7, %p243_p9 }
  0x17   : > { %3062 = sst [smem:[#allocation16_spill]] %s3061_s16  ;;  %p217_p11 = scmp.eq.s32.totalorder %s216_s18, 0 }
  0x18   : > { %p2589_p12 = scmp.eq.s32.totalorder %s1912_s9, 0  ;;  %p2204_p13 = pneg %p2585_p10 }
  0x19   : > { %s3065_s0 = sld [smem:[#allocation18_spill]] }
  0x1a   : > { %s2599_s10 = scalar_select %p217_p11, %s2448_s26, %s219_s13  }
  0x1b   : > { %p2205_p0 = pnand %p2589_p12, %p2204_p13 }
  0x1c   : > { %3066 = sst [smem:[#allocation17_spill]] %s2599_s10 }
  0x1d   : > { %p2359_p2 = pneg %p2205_p0 }
  0x1f   : > { %s256_s23 = sshll.u32 %s3065_s0, 4  ;;  %s257_s23 = int_to_ptr.vmem [resolvable:$true] %s256_s23 }
  0x20   : > { %s2357_s14 = scalar_lea.vmem %s257_s23, 32  ;;  %p2365_p6 = scmp.lt.s32.totalorder %s257_s23, %s257_s23 }
  0x21   : > { %p2358_p1 = scmp.ne.s32.totalorder %s257_s23, %s2357_s14  ;;  %p2366_p7 = scmp.lt.s32.totalorder %s2357_s14, %s2357_s14 }
  0x23   : > { %p2360_p4 = pnand %p2359_p2, %p2358_p1  ;;  %p2367_p9 = por %p2366_p7, %p2365_p6 }
  0x25   : > { %p2361_p5 = pneg %p2360_p4 }
  0x27   : > { %p2368_p8 = pnand %p2367_p9, %p2361_p5 }
  0x29   : > { %2371 = shalt.err (!%p2368_p8)
}
  0x2a   : > { %s2470_s9 = smov [#allocation4]   ;;  %316 = sbr.rel (%p2585_p10) target bundleno = 9436 (0x24dc), region = 48 }
  0x2b   : > { %2207 = dma.vmem_to_smem (!%p2205_p0), %s257_s23, 32, %s2470_s9, [#allocation6]  }
  0x2f   : > { %2431 = dma.done.wait (%p2589_p12), [#allocation6], 32  }
  0x30   : > { %2433 = vsyncadd (%p2589_p12), [#allocation6], 4294967264 }
  0x31   : > { %322 = sfence }
  0x32   : > { %s3049_s13 = sand.u32 1, %s2444_s25   ;;  %p373_p8 = scmp.lt.s32.totalorder %s2456_s28, 1 }
  0x33   : > { %s2613_s17 = sshll.u32 %s3049_s13, 2  ;;  %p377_p10 = scmp.lt.s32.totalorder %s2452_s27, 1 }
  0x34   : > { %s374_s18 = scalar_select %p373_p8, %s2456_s28, 1 }
  0x35   : > { %s378_s19 = scalar_select %p377_p10, %s2452_s27, 1 }
  0x36   : > { %s1920_s21 = sshll.u32 %s374_s18, 2  ;;  %p1931_p11 = scmp.ne.s32.totalorder %s2452_s27, 0 }
  0x37   : > { %s376_s23 = scalar_lea.vmem %s3038_s1, %s1920_s21  ;;  %s1977_s14 = sshll.u32 %s378_s19, 4 }
  0x38   : > { %s381_s12 = scalar_lea.vmem %s3039_s2, %s1977_s14  ;;  %s1978_s11 = sshll.u32 %s378_s19, 5 }
  0x39   : > { %s2627_s13 = scalar_lea.vmem %s3040_s3, %s1978_s11  ;;  %s2632_s16 = scalar_lea.vmem %s3041_s4, %s1977_s14 }
  0x3a   : > { %s2637_s21 = scalar_lea.vmem %s3042_s5, %s1978_s11  ;;  %s2642_s0 = scalar_lea.vmem %s3043_s6, %s1977_s14 }
  0x3b   : > { %s372_s19 = scalar_lea.vmem [#allocation7], %s2613_s17  ;;  %406 = sbr.rel (%p1931_p11) target bundleno = 68 (0x44), region = 56 }
  0x40   : > { %v407_v0 = vld [vmem:[%s376_s23] sm:$0xf]  ;;  %vm409_vm0 = vcmask 261120  }
  0x41   : > { %v408_v1 = vunpack.c.l.bf16 %v407_v0 }
  0x43   : > { %410 = vst.msk [vmem:[#allocation2] sm:$0xff] %vm409_vm0, %v408_v1  ;;  %411 = vst.msk [vmem:[#allocation3] sm:$0xff] %vm409_vm0, %v408_v1 }
  0x44 PF: > { %v2646_v2 = vld [vmem:[%s381_s12 + $0x8] sm:$0xff]   ;;  %v2471_v3 = vmov 0.0   ;;  %v2651_v4 = vld [vmem:[%s381_s12] sm:$0xff]   ;;  %vm2472_vm1 = vmmov 0   ;;  %vm459_vm2 = vcmask 261120   ;;  %v510_v7 = vlaneseq  ;;  %s2473_s24 = smov 112  }
  0x45   : > { %2042 = vmatprep.subr.bf16.mxu1 %v2471_v3  ;;  %2056 = vmatprep.subr.bf16.mxu0 %v2471_v3  ;;  %v2671_v10 = vld [vmem:[%s2642_s0] sm:$0xff]  ;;  %vm532_vm3 = vcmask 130048   ;;  %vm600_vm4 = vcmask 1043456   ;;  %vm580_vm5 = vcmask 64512   ;;  %s2474_s26 = smov 80   ;;  %v2712_v48 = vld [vmem:[%s2627_s13 + $0x18] sm:$0xff]  }
  0x46   : > { %2043 = vmatpush3.bf16.msra.mxu1 %v2646_v2  ;;  %2046 = vmatprep.mubr.msk.bf16.mxu1 %vm2472_vm1, %v2471_v3  ;;  %v2667_v8 = vshrl.u32 %v510_v7, 7  ;;  %v2716_v49 = vld [vmem:[%s2627_s13 + $0x10] sm:$0xff]   ;;  %v2721_v50 = vld [vmem:[%s2627_s13 + $0x8] sm:$0xff]   ;;  %v2730_v55 = vld [vmem:[%s2627_s13] sm:$0xff]   ;;  %vm669_vm6 = vcmask 523264   ;;  %s2475_s29 = smov 48  }
  0x47   : > { %2044 = vmatprep.subr.bf16.mxu1 %v2471_v3  ;;  %2058 = vmatprep.mubr.msk.bf16.mxu0 %vm2472_vm1, %v2471_v3  ;;  %s1932_s30 = sshll.u32 %s2452_s27, 7  ;;  %s1973_s23 = sshll.u32 %s2452_s27, 1  ;;  %vm1750_vm7 = vcmask 257024  }
  0x48   : > { %v522_v9 = vsub.s32 2, %v2667_v8  ;;  %v527_v11 = vsub.s32 3, %v2667_v8  ;;  %v512_v12 = vsub.s32 0, %v2667_v8  ;;  %v517_v18 = vsub.s32 1, %v2667_v8  ;;  %s413_s11 = sld [smem:[#allocation4 + %s1932_s30]]  ;;  %s414_s12 = sadd.s32 1, %s1932_s30 }
  0x49   : > { %s416_s10 = sadd.s32 2, %s1932_s30  ;;  %s1764_s14 = sadd.s32 %s2456_s28, %s1973_s23 }
  0x4a   : > { %v2655_v5 = vld [vmem:[#allocation2] sm:$0xff]  ;;  %2045 = vmatpush3.bf16.msra.mxu1 %v2651_v4  ;;  %v2676_v13 = vrot.slane %v2671_v10, %v522_v9  ;;  %v2679_v14 = vrot.slane %v2671_v10, %v527_v11  ;;  %v2684_v17 = vrot.slane %v2671_v10, %v512_v12  ;;  %v2693_v24 = vrot.slane %v2671_v10, %v517_v18  ;;  %s2905_s13 = sld [smem:[#allocation4 + %s416_s10]]  ;;  %s1974_s9 = sshll.u32 %s1764_s14, 6 }
  0x4b   : > { %v446_v6 = vpack.c.bf16 %v2655_v5, %v2655_v5  ;;  %2050 = vmatprep.subr.bf16.mxu1 %v2471_v3  ;;  %s1768_s18 = sshll.u32 %s372_s19, 4  ;;  %s1766_s27 = scalar_lea.hbm %s3044_s7, %s1974_s9  ;;  %s1769_s18 = int_to_ptr.vmem [resolvable:$true] %s1768_s18 }
  0x4c   : > { %s3067_s28 = sand.u32 1, %s2444_s25  }
  0x4d   : > { %2047 = vmatmul.mubr.msk.bf16.vlgmr.msra.gmra.mxu1 %vm459_vm2, %v446_v6  ;;  %s1753_s20 = scalar_lea.sflag [#allocation5], %s3067_s28 }
  0x4e   : > { %2052 = vmatprep.mubr.msk.bf16.mxu1 %vm2472_vm1, %v2471_v3 }
 0x10d   : > { %v497_v15 = vpop.f32.mrf.mxu1 }
 0x10e   : > { %v1936_v16 = vmul.f32 -1.442695, %v497_v15  ;;  %v524_v19 = vmul.f32 %v2676_v13, %v497_v15  ;;  %v514_v23 = vmul.f32 %v2684_v17, %v497_v15 }
 0x10f   : > { %v2048_v20 = vpop.f32.mrf.mxu1 }
 0x110   : > { %2297 = vpow2.f32 %v1936_v16  ;;  %v529_v21 = vadd.f32 %v2679_v14, %v524_v19  ;;  %v519_v28 = vadd.f32 %v2693_v24, %v514_v23 }
 0x111   : > { %v500_v22 = vpop.f32.mrf.mxu1 }
 0x112   : > { %v531_v25 = vpack.c.bf16 %v529_v21, %v529_v21  ;;  %v530_v29 = vpack.c.bf16 %v519_v28, %v519_v28 }
 0x113   : > { %v2049_v26 = vpop.f32.mrf.mxu1 }
 0x114   : > { %v537_v27 = vsel %vm532_vm3, %v531_v25, 0  ;;  %v756_v26 = vsub.s32 4, %v2667_v8 }
 0x115   : > { %2051 = vmatpush3.bf16.xpose.msra.mxu1 %v537_v27 }
 0x116   : > { %2062 = vmatprep.subr.bf16.mxu1 %v2471_v3  ;;  %v757_v27 = vrot.slane %v2671_v10, %v756_v26 }
 0x11c   : > { %2053 = vmatmul.mubr.msk.bf16.vlgmr.msra.gmra.mxu1 %vm532_vm3, %v530_v29 }
 0x11d   : > { %v2298_v30 = vpop.eup %2297  ;;  %2070 = vmatprep.mubr.msk.bf16.mxu1 %vm2472_vm1, %v2471_v3  ;;  %2063 = vmatpush3.bf16.msra.mxu1 %v2712_v48 }
 0x11e   : > { %v506_v31 = vadd.f32 1.0, %v2298_v30  ;;  %2064 = vmatprep.subr.bf16.mxu1 %v2471_v3 }
 0x120   : > { %2299 = vrcp.f32 %v506_v31 }
 0x121   : > { %2065 = vmatpush3.bf16.msra.mxu1 %v2716_v49 }
 0x122   : > { %2066 = vmatprep.subr.bf16.mxu1 %v2471_v3 }
 0x125   : > { %2067 = vmatpush3.bf16.msra.mxu1 %v2721_v50 }
 0x126   : > { %2068 = vmatprep.subr.bf16.mxu1 %v2471_v3 }
 0x129   : > { %2069 = vmatpush3.bf16.msra.mxu1 %v2730_v55 }
 0x12a   : > { %2094 = vmatprep.subr.bf16.mxu1 %v2471_v3 }
 0x12d   : > { %v2701_v32 = vpop.eup %2299 }
 0x12e   : > { %v509_v33 = vmul.f32 %v2701_v32, %v497_v15  ;;  %v725_v16 = vsub.f32 1.0, %v2701_v32 }
 0x130   : > { %v593_v34 = vpack.c.bf16 %v509_v33, %v509_v33 }
 0x132   : > { %595 = vrot.lane.b32.xlu1 %v593_v34, %s2473_s24  ;;  %v765_v34 = vsub.s32 5, %v2667_v8 }
 0x1a4   : > { %v596_v35 = vpop.permute.xlu1 %595 }
 0x1a5   : > { %v602_v36 = vsel %vm600_vm4, %v596_v35, 0  ;;  %v766_v35 = vrot.slane %v2671_v10, %v765_v34 }
 0x1a6   : > { %2057 = vmatpush3.bf16.msra.mxu0 %v602_v36  ;;  %v2755_v36 = vld [vmem:[%s2632_s16 + $0x8] sm:$0xff]  }
 0x1a7   : > { %2074 = vmatprep.subr.bf16.mxu0 %v2471_v3 }
 0x1dc   : > { %v573_v37 = vpop.f32.mrf.mxu1 }
 0x1dd   : > { %v579_v38 = vmul.f32 0.25, %v573_v37  ;;  %v2759_v37 = vld [vmem:[%s2632_s16] sm:$0xff]   ;;  %s415_s16 = sld [smem:[#allocation4 + %s414_s12]] }
 0x1de   : > { %v2054_v39 = vpop.f32.mrf.mxu1 }
 0x1df   : > { %v581_v40 = vsel %vm580_vm5, %v579_v38, -inf }
 0x1e0   : > { %582 = vmax.xlane.f32.xlu0 %v581_v40  ;;  %v576_v41 = vpop.f32.mrf.mxu1 }
 0x1e2   : > { %v2055_v42 = vpop.f32.mrf.mxu1 }
 0x269   : > { %v583_v43 = vpop.xlane.xlu0 %582 }
 0x26a   : > { %v584_v44 = vsub.f32 %v579_v38, %v583_v43 }
 0x26c   : > { %v585_v45 = vmul.f32 1.442695, %v584_v44 }
 0x26e   : > { %2301 = vpow2.f32 %v585_v45 }
 0x27b   : > { %v2302_v46 = vpop.eup %2301 }
 0x27c   : > { %v587_v47 = vsel %vm580_vm5, %v2302_v46, 0.0 }
 0x27d   : > { %588 = vadd.xlane.f32.xlu0 %v587_v47 }
 0x293   : > { %727 = vrot.lane.b32.xlu0 %v2655_v5, %s2474_s26 }
 0x306   : > { %v589_v51 = vpop.xlane.xlu0 %588 }
 0x307   : > { %2303 = vrcp.f32 %v589_v51 }
 0x30a   : > { %v728_v15 = vpop.permute.xlu0 %727 }
 0x30b   : > { %v730_v20 = vmul.f32 %v728_v15, %v725_v16  ;;  %v845_v15 = vsub.s32 7, %v2667_v8 }
 0x30d   : > { %v2804_v16 = vrot.slane %v2671_v10, %v845_v15 }
 0x314   : > { %v2304_v52 = vpop.eup %2303 }
 0x315   : > { %v591_v53 = vmul.f32 %v2304_v52, %v2302_v46  ;;  %v2775_v52 = vld [vmem:[%s2637_s21 + $0x18] sm:$0xff]  }
 0x317   : > { %v592_v54 = vpack.c.bf16 %v591_v53, %v591_v53  ;;  %v2780_v53 = vld [vmem:[%s2637_s21 + $0x10] sm:$0xff]  }
 0x319   : > { %2059 = vmatmul.mubr.msk.bf16.vlgmr.msra.gmra.mxu0 %vm580_vm5, %v592_v54  ;;  %v2785_v54 = vld [vmem:[%s2637_s21 + $0x8] sm:$0xff]  }
 0x31a   : > { %2078 = vmatprep.mubr.msk.bf16.mxu0 %vm2472_vm1, %v2471_v3  ;;  %2075 = vmatpush3.bf16.msra.mxu0 %v2755_v36 }
 0x31b   : > { %2076 = vmatprep.subr.bf16.mxu0 %v2471_v3 }
 0x31e   : > { %2077 = vmatpush3.bf16.msra.mxu0 %v2759_v37 }
 0x31f   : > { %2082 = vmatprep.subr.bf16.mxu0 %v2471_v3 }
 0x3d9   : > { %v638_v56 = vpop.f32.mrf.mxu0 }
 0x3da   : > { %v644_v57 = vpack.c.bf16 %v638_v56, %v638_v56  ;;  %v2790_v56 = vld [vmem:[%s2637_s21] sm:$0xff]  }
 0x3db   : > { %v2060_v58 = vpop.f32.mrf.mxu0 }
 0x3dc   : > { %2071 = vmatmul.mubr.msk.bf16.vlgmr.msra.gmra.mxu1 %vm669_vm6, %v644_v57  ;;  %v775_v57 = vsub.s32 6, %v2667_v8 }
 0x3dd   : > { %v641_v59 = vpop.f32.mrf.mxu0  ;;  %2095 = vmatpush3.bf16.msra.mxu1 %v2646_v2  ;;  %2098 = vmatprep.mubr.msk.bf16.mxu1 %vm2472_vm1, %v2471_v3 }
 0x3de   : > { %2096 = vmatprep.subr.bf16.mxu1 %v2471_v3  ;;  %v2796_v58 = vrot.slane %v2671_v10, %v775_v57 }
 0x3df   : > { %v2061_v60 = vpop.f32.mrf.mxu0 }
 0x3e1   : > { %2097 = vmatpush3.bf16.msra.mxu1 %v2651_v4 }
 0x3e2   : > { %2102 = vmatprep.subr.bf16.mxu1 %v2471_v3 }
 0x49c   : > { %v707_v61 = vpop.f32.mrf.mxu1 }
 0x49d   : > { %v1944_v62 = vmul.f32 -1.442695, %v707_v61 }
 0x49e   : > { %v2072_v63 = vpop.f32.mrf.mxu1 }
 0x49f   : > { %2305 = vpow2.f32 %v1944_v62 }
 0x4a0   : > { %v710_v0 = vpop.f32.mrf.mxu1 }
 0x4a2   : > { %v2073_v1 = vpop.f32.mrf.mxu1 }
 0x4ac   : > { %v2306_v6 = vpop.eup %2305 }
 0x4ad   : > { %v716_v7 = vadd.f32 1.0, %v2306_v6 }
 0x4af   : > { %2307 = vrcp.f32 %v716_v7 }
 0x4bc   : > { %v2308_v9 = vpop.eup %2307 }
 0x4bd   : > { %v719_v11 = vmul.f32 %v2308_v9, %v707_v61 }
 0x4bf   : > { %721 = vrot.lane.b32.xlu1 %v719_v11, %s2474_s26 }
 0x531   : > { %v722_v19 = vpop.permute.xlu1 %721 }
 0x532   : > { %v724_v21 = vmul.f32 %v2701_v32, %v722_v19 }
 0x534   : > { %v731_v22 = vadd.f32 %v730_v20, %v724_v21 }
 0x536   : > { %733 = vrot.lane.b32.xlu1 %v731_v22, %s2475_s29 }
 0x5a8   : > { %v734_v23 = vpop.permute.xlu1 %733 }
 0x5a9   : > { %v736_v25 = vsel %vm459_vm2, %v734_v23, 0.0 }
 0x5aa   : > { %737 = vadd.xlane.f32.xlu1 %v736_v25 }
 0x5bb   : > { %759 = vrot.lane.b32.xlu1 %v757_v27, %s2474_s26 }
 0x633   : > { %v738_v28 = vpop.xlane.xlu1 %737 }
 0x634   : > { %v740_v29 = vmul.f32 0.03125, %v738_v28 }
 0x636   : > { %v741_v30 = vsub.f32 %v731_v22, %v740_v29  ;;  %v419_v29 = vld [vmem:[%s2642_s0 + $0x8] sm:$0x3]  ;;  %s2372_s0 = scalar_lea.vmem %s1769_s18, 64 }
 0x637   : > { %v2764_v42 = vpop.permute.xlu1 %759  ;;  %v943_v10 = vrot.slane %v419_v29, %v512_v12  ;;  %p2373_p12 = scmp.ne.s32.totalorder %s1769_s18, %s2372_s0 }
 0x638   : > { %v742_v31 = vmul.f32 %v741_v30, %v741_v30 }
 0x639   : > { %p2374_p13 = pnand %p2373_p12, %p2569_p3 }
 0x63a   : > { %744 = vrot.lane.b32.xlu0 %v742_v31, %s2475_s29 }
 0x63b   : > { %p2375_p0 = pneg %p2374_p13 }
 0x6ac   : > { %v745_v32 = vpop.permute.xlu0 %744 }
 0x6ad   : > { %v747_v33 = vsel %vm459_vm2, %v745_v32, 0.0 }
 0x6ae   : > { %748 = vadd.xlane.f32.xlu0 %v747_v33 }
 0x6c4   : > { %768 = vrot.lane.b32.xlu0 %v766_v35, %s2474_s26 }
 0x737   : > { %v749_v38 = vpop.xlane.xlu0 %748 }
 0x738   : > { %v750_v39 = vmul.f32 0.03125, %v749_v38  ;;  %v952_v38 = vrot.slane %v419_v29, %v517_v18 }
 0x73a   : > { %v751_v40 = vadd.f32 1e-05, %v750_v39 }
 0x73b   : > { %v2766_v44 = vpop.permute.xlu0 %768 }
 0x73c   : > { %2309 = vrsqrt.f32 %v751_v40 }
 0x749   : > { %v2310_v41 = vpop.eup %2309 }
 0x74a   : > { %v753_v43 = vmul.f32 %v2310_v41, %v741_v30 }
 0x74c   : > { %v762_v45 = vmul.f32 %v2764_v42, %v753_v43 }
 0x74e   : > { %v771_v46 = vadd.f32 %v2766_v44, %v762_v45 }
 0x750   : > { %v772_v47 = vpack.c.bf16 %v771_v46, %v771_v46 }
 0x752   : > { %778 = vrot.lane.b32.xlu1 %v772_v47, %s2475_s29 }
 0x7c4   : > { %v779_v51 = vpop.permute.xlu1 %778 }
 0x7c5   : > { %2079 = vmatmul.mubr.msk.bf16.vlgmr.msra.gmra.mxu0 %vm459_vm2, %v779_v51 }
 0x7c6   : > { %2090 = vmatprep.mubr.msk.bf16.mxu0 %vm2472_vm1, %v2471_v3  ;;  %2083 = vmatpush3.bf16.msra.mxu0 %v2775_v52 }
 0x7c7   : > { %2084 = vmatprep.subr.bf16.mxu0 %v2471_v3 }
 0x7ca   : > { %2085 = vmatpush3.bf16.msra.mxu0 %v2780_v53 }
 0x7cb   : > { %2086 = vmatprep.subr.bf16.mxu0 %v2471_v3 }
 0x7ce   : > { %2087 = vmatpush3.bf16.msra.mxu0 %v2785_v54 }
 0x7cf   : > { %2088 = vmatprep.subr.bf16.mxu0 %v2471_v3 }
 0x7d2   : > { %2089 = vmatpush3.bf16.msra.mxu0 %v2790_v56 }
 0x7d3   : > { %2108 = vmatprep.subr.bf16.mxu0 %v2471_v3 }
 0x885   : > { %v829_v59 = vpop.f32.mrf.mxu0 }
 0x886   : > { %v830_v60 = vadd.f32 %v829_v59, %v2796_v58 }
 0x887   : > { %v2080_v61 = vpop.f32.mrf.mxu0 }
 0x888   : > { %v1948_v62 = vmul.f32 -1.442695, %v830_v60 }
 0x889   : > { %v832_v63 = vpop.f32.mrf.mxu0 }
 0x88a   : > { %2311 = vpow2.f32 %v1948_v62 }
 0x88b   : > { %v2081_v0 = vpop.f32.mrf.mxu0 }
 0x897   : > { %v2312_v1 = vpop.eup %2311 }
 0x898   : > { %v838_v6 = vadd.f32 1.0, %v2312_v1 }
 0x89a   : > { %2313 = vrcp.f32 %v838_v6 }
 0x8a7   : > { %v2314_v7 = vpop.eup %2313 }
 0x8a8   : > { %v841_v9 = vmul.f32 %v2314_v7, %v830_v60 }
 0x8aa   : > { %v842_v11 = vpack.c.bf16 %v841_v9, %v841_v9 }
 0x8ac   : > { %2091 = vmatmul.mubr.msk.bf16.vlgmr.msra.gmra.mxu0 %vm669_vm6, %v842_v11 }
 0x8ad   : > { %2110 = vmatprep.mubr.msk.bf16.mxu0 %vm2472_vm1, %v2471_v3 }
 0x96c   : > { %v908_v19 = vpop.f32.mrf.mxu0 }
 0x96d   : > { %v909_v20 = vadd.f32 %v908_v19, %v2804_v16 }
 0x96e   : > { %v2092_v21 = vpop.f32.mrf.mxu0 }
 0x96f   : > { %915 = vrot.lane.b32.xlu1 %v909_v20, %s2474_s26 }
 0x970   : > { %v911_v22 = vpop.f32.mrf.mxu0 }
 0x972   : > { %v2093_v23 = vpop.f32.mrf.mxu0 }
 0x9e1   : > { %v916_v25 = vpop.permute.xlu1 %915 }
 0x9e2   : > { %v918_v26 = vadd.f32 %v916_v25, %v771_v46 }
 0x9e4   : > { %920 = vrot.lane.b32.xlu1 %v918_v26, %s2475_s29 }
 0xa56   : > { %v921_v27 = vpop.permute.xlu1 %920 }
 0xa57   : > { %v923_v28 = vsel %vm459_vm2, %v921_v27, 0.0 }
 0xa58   : > { %924 = vadd.xlane.f32.xlu1 %v923_v28 }
 0xa69   : > { %945 = vrot.lane.b32.xlu1 %v943_v10, %s2474_s26 }
 0xae1   : > { %v925_v30 = vpop.xlane.xlu1 %924 }
 0xae2   : > { %v926_v31 = vmul.f32 0.03125, %v925_v30 }
 0xae4   : > { %v927_v32 = vsub.f32 %v918_v26, %v926_v31 }
 0xae5   : > { %v2819_v43 = vpop.permute.xlu1 %945 }
 0xae6   : > { %v928_v33 = vmul.f32 %v927_v32, %v927_v32 }
 0xae8   : > { %930 = vrot.lane.b32.xlu0 %v928_v33, %s2475_s29 }
 0xb5a   : > { %v931_v34 = vpop.permute.xlu0 %930 }
 0xb5b   : > { %v933_v35 = vsel %vm459_vm2, %v931_v34, 0.0 }
 0xb5c   : > { %934 = vadd.xlane.f32.xlu0 %v933_v35 }
 0xb72   : > { %954 = vrot.lane.b32.xlu0 %v952_v38, %s2474_s26 }
 0xbe5   : > { %v935_v39 = vpop.xlane.xlu0 %934 }
 0xbe6   : > { %v936_v40 = vmul.f32 0.03125, %v935_v39 }
 0xbe8   : > { %v937_v12 = vadd.f32 1e-05, %v936_v40 }
 0xbe9   : > { %v2821_v46 = vpop.permute.xlu0 %954 }
 0xbea   : > { %2315 = vrsqrt.f32 %v937_v12 }
 0xbf7   : > { %v2316_v41 = vpop.eup %2315 }
 0xbf8   : > { %v939_v45 = vmul.f32 %v2316_v41, %v927_v32 }
 0xbfa   : > { %v948_v47 = vmul.f32 %v2819_v43, %v939_v45 }
 0xbfc   : > { %v2825_v51 = vadd.f32 %v2821_v46, %v948_v47 }
 0xbfe   : > { %959 = vrot.lane.b32.xlu1 %v2825_v51, %s2475_s29 }
 0xc70   : > { %v960_v8 = vpop.permute.xlu1 %959 }
 0xc71   : > { %v962_v18 = vadd.f32 %v960_v8, %v2655_v5 }
 0xc73   : > { %v963_v57 = vpack.c.bf16 %v962_v18, %v962_v18 }
 0xc75   : > { %2099 = vmatmul.mubr.msk.bf16.vlgmr.msra.gmra.mxu1 %vm459_vm2, %v963_v57 }
 0xc76   : > { %2104 = vmatprep.mubr.msk.bf16.mxu1 %vm2472_vm1, %v2471_v3 }
 0xd35   : > { %v1001_v59 = vpop.f32.mrf.mxu1 }
 0xd36   : > { %v1016_v60 = vmul.f32 %v1001_v59, %v2676_v13  ;;  %v1014_v0 = vmul.f32 %v1001_v59, %v2684_v17  ;;  %v1955_v15 = vmul.f32 -1.442695, %v1001_v59 }
 0xd37   : > { %v2100_v61 = vpop.f32.mrf.mxu1 }
 0xd38   : > { %v1017_v62 = vadd.f32 %v1016_v60, %v2679_v14  ;;  %v1015_v9 = vadd.f32 %v1014_v0, %v2693_v24  ;;  %2317 = vpow2.f32 %v1955_v15 }
 0xd39   : > { %v1004_v63 = vpop.f32.mrf.mxu1 }
 0xd3a   : > { %v1019_v1 = vpack.c.bf16 %v1017_v62, %v1017_v62  ;;  %v1018_v11 = vpack.c.bf16 %v1015_v9, %v1015_v9 }
 0xd3b   : > { %v2101_v6 = vpop.f32.mrf.mxu1 }
 0xd3c   : > { %v1024_v7 = vsel %vm532_vm3, %v1019_v1, 0 }
 0xd3d   : > { %2103 = vmatpush3.bf16.xpose.msra.mxu1 %v1024_v7 }
 0xd3e   : > { %2114 = vmatprep.subr.bf16.mxu1 %v2471_v3 }
 0xd44   : > { %2105 = vmatmul.mubr.msk.bf16.vlgmr.msra.gmra.mxu1 %vm532_vm3, %v1018_v11 }
 0xd45   : > { %2115 = vmatpush3.bf16.msra.mxu1 %v2712_v48  ;;  %2122 = vmatprep.mubr.msk.bf16.mxu1 %vm2472_vm1, %v2471_v3  ;;  %v2318_v19 = vpop.eup %2317 }
 0xd46   : > { %2116 = vmatprep.subr.bf16.mxu1 %v2471_v3  ;;  %v1010_v20 = vadd.f32 1.0, %v2318_v19 }
 0xd48   : > { %2319 = vrcp.f32 %v1010_v20 }
 0xd49   : > { %2117 = vmatpush3.bf16.msra.mxu1 %v2716_v49 }
 0xd4a   : > { %2118 = vmatprep.subr.bf16.mxu1 %v2471_v3 }
 0xd4d   : > { %2119 = vmatpush3.bf16.msra.mxu1 %v2721_v50 }
 0xd4e   : > { %2120 = vmatprep.subr.bf16.mxu1 %v2471_v3 }
 0xd51   : > { %2121 = vmatpush3.bf16.msra.mxu1 %v2730_v55 }
 0xd52   : > { %2146 = vmatprep.subr.bf16.mxu1 %v2471_v3 }
 0xd55   : > { %v2320_v28 = vpop.eup %2319 }
 0xd56   : > { %v1013_v29 = vmul.f32 %v2320_v28, %v1001_v59  ;;  %v1185_v9 = vsub.f32 1.0, %v2320_v28 }
 0xd58   : > { %v1079_v10 = vpack.c.bf16 %v1013_v29, %v1013_v29 }
 0xe04   : > { %v1060_v21 = vpop.f32.mrf.mxu1 }
 0xe05   : > { %v1066_v22 = vmul.f32 0.25, %v1060_v21 }
 0xe06   : > { %v2106_v23 = vpop.f32.mrf.mxu1 }
 0xe07   : > { %v1067_v25 = vsel %vm580_vm5, %v1066_v22, -inf }
 0xe08   : > { %1068 = vmax.xlane.f32.xlu1 %v1067_v25  ;;  %v1063_v26 = vpop.f32.mrf.mxu1 }
 0xe0a   : > { %v2107_v27 = vpop.f32.mrf.mxu1 }
 0xe19   : > { %1081 = vrot.lane.b32.xlu1 %v1079_v10, %s2473_s24 }
 0xe1d   : > { %1187 = vrot.lane.b32.xlu1 %v962_v18, %s2474_s26 }
 0xe91   : > { %v1069_v30 = vpop.xlane.xlu1 %1068 }
 0xe92   : > { %v1070_v31 = vsub.f32 %v1066_v22, %v1069_v30 }
 0xe94   : > { %v1071_v32 = vmul.f32 1.442695, %v1070_v31 }
 0xe95   : > { %v1082_v33 = vpop.permute.xlu1 %1081 }
 0xe96   : > { %2321 = vpow2.f32 %v1071_v32  ;;  %v1087_v34 = vsel %vm600_vm4, %v1082_v33, 0 }
 0xe97   : > { %2109 = vmatpush3.bf16.msra.mxu0 %v1087_v34 }
 0xe98   : > { %2126 = vmatprep.subr.bf16.mxu0 %v2471_v3 }
 0xe99   : > { %v1188_v7 = vpop.permute.xlu1 %1187 }
 0xe9a   : > { %v1190_v15 = vmul.f32 %v1188_v7, %v1185_v9 }
 0xea3   : > { %v2322_v35 = vpop.eup %2321 }
 0xea4   : > { %v1073_v38 = vsel %vm580_vm5, %v2322_v35, 0.0 }
 0xea5   : > { %1074 = vadd.xlane.f32.xlu0 %v1073_v38 }
 0xf2e   : > { %v1075_v39 = vpop.xlane.xlu0 %1074 }
 0xf2f   : > { %2323 = vrcp.f32 %v1075_v39 }
 0xf3c   : > { %v2324_v40 = vpop.eup %2323 }
 0xf3d   : > { %v1077_v12 = vmul.f32 %v2324_v40, %v2322_v35 }
 0xf3f   : > { %v1078_v41 = vpack.c.bf16 %v1077_v12, %v1077_v12 }
 0xf41   : > { %2111 = vmatmul.mubr.msk.bf16.vlgmr.msra.gmra.mxu0 %vm580_vm5, %v1078_v41 }
 0xf42   : > { %2127 = vmatpush3.bf16.msra.mxu0 %v2755_v36  ;;  %2130 = vmatprep.mubr.msk.bf16.mxu0 %vm2472_vm1, %v2471_v3 }
 0xf43   : > { %2128 = vmatprep.subr.bf16.mxu0 %v2471_v3 }
 0xf46   : > { %2129 = vmatpush3.bf16.msra.mxu0 %v2759_v37 }
 0xf47   : > { %2134 = vmatprep.subr.bf16.mxu0 %v2471_v3 }
0x1001   : > { %v1123_v45 = vpop.f32.mrf.mxu0 }
0x1002   : > { %v1129_v47 = vpack.c.bf16 %v1123_v45, %v1123_v45 }
0x1003   : > { %v2112_v8 = vpop.f32.mrf.mxu0 }
0x1004   : > { %2123 = vmatmul.mubr.msk.bf16.vlgmr.msra.gmra.mxu1 %vm669_vm6, %v1129_v47 }
0x1005   : > { %v1126_v18 = vpop.f32.mrf.mxu0  ;;  %2147 = vmatpush3.bf16.msra.mxu1 %v2646_v2  ;;  %2150 = vmatprep.mubr.msk.bf16.mxu1 %vm2472_vm1, %v2471_v3 }
0x1006   : > { %2148 = vmatprep.subr.bf16.mxu1 %v2471_v3 }
0x1007   : > { %v2113_v57 = vpop.f32.mrf.mxu0 }
0x1009   : > { %2149 = vmatpush3.bf16.msra.mxu1 %v2651_v4 }
0x100a   : > { %2154 = vmatprep.subr.bf16.mxu1 %v2471_v3 }
0x10c4   : > { %v1167_v59 = vpop.f32.mrf.mxu1 }
0x10c5   : > { %v1959_v60 = vmul.f32 -1.442695, %v1167_v59 }
0x10c6   : > { %v2124_v61 = vpop.f32.mrf.mxu1 }
0x10c7   : > { %2325 = vpow2.f32 %v1959_v60 }
0x10c8   : > { %v1170_v62 = vpop.f32.mrf.mxu1 }
0x10ca   : > { %v2125_v63 = vpop.f32.mrf.mxu1 }
0x10d4   : > { %v2326_v0 = vpop.eup %2325 }
0x10d5   : > { %v1176_v1 = vadd.f32 1.0, %v2326_v0 }
0x10d7   : > { %2327 = vrcp.f32 %v1176_v1 }
0x10e4   : > { %v2328_v2 = vpop.eup %2327 }
0x10e5   : > { %v1179_v6 = vmul.f32 %v2328_v2, %v1167_v59 }
0x10e7   : > { %1181 = vrot.lane.b32.xlu0 %v1179_v6, %s2474_s26 }
0x1159   : > { %v1182_v11 = vpop.permute.xlu0 %1181 }
0x115a   : > { %v1184_v4 = vmul.f32 %v2320_v28, %v1182_v11  ;;  %v1341_v11 = vstv %s413_s11 }
0x115c   : > { %v1191_v19 = vadd.f32 %v1190_v15, %v1184_v4  ;;  %v1342_v15 = vmul.f32 %v1341_v11, %v2825_v51 }
0x115e   : > { %1193 = vrot.lane.b32.xlu1 %v1191_v19, %s2475_s29 }
0x11d0   : > { %v1194_v20 = vpop.permute.xlu1 %1193 }
0x11d1   : > { %v1196_v21 = vsel %vm459_vm2, %v1194_v20, 0.0 }
0x11d2   : > { %1197 = vadd.xlane.f32.xlu1 %v1196_v21 }
0x125b   : > { %v1198_v22 = vpop.xlane.xlu1 %1197 }
0x125c   : > { %v1199_v23 = vmul.f32 0.03125, %v1198_v22 }
0x125e   : > { %v1200_v25 = vsub.f32 %v1191_v19, %v1199_v23 }
0x1260   : > { %v1201_v26 = vmul.f32 %v1200_v25, %v1200_v25 }
0x1262   : > { %1203 = vrot.lane.b32.xlu0 %v1201_v26, %s2475_s29 }
0x12d4   : > { %v1204_v27 = vpop.permute.xlu0 %1203 }
0x12d5   : > { %v1206_v29 = vsel %vm459_vm2, %v1204_v27, 0.0 }
0x12d6   : > { %1207 = vadd.xlane.f32.xlu0 %v1206_v29 }
0x135f   : > { %v1208_v10 = vpop.xlane.xlu0 %1207 }
0x1360   : > { %v1209_v30 = vmul.f32 0.03125, %v1208_v10 }
0x1362   : > { %v1210_v28 = vadd.f32 1e-05, %v1209_v30  ;;  %v1348_v30 = vstv %s415_s16 }
0x1364   : > { %2329 = vrsqrt.f32 %v1210_v28 }
0x1371   : > { %v2330_v31 = vpop.eup %2329 }
0x1372   : > { %v1212_v32 = vmul.f32 %v2330_v31, %v1200_v25 }
0x1374   : > { %v1213_v33 = vmul.f32 %v1212_v32, %v2764_v42 }
0x1376   : > { %v1214_v34 = vadd.f32 %v1213_v33, %v2766_v44 }
0x1378   : > { %v1215_v35 = vpack.c.bf16 %v1214_v34, %v1214_v34 }
0x137a   : > { %1217 = vrot.lane.b32.xlu1 %v1215_v35, %s2475_s29 }
0x13ec   : > { %v1218_v38 = vpop.permute.xlu1 %1217 }
0x13ed   : > { %2131 = vmatmul.mubr.msk.bf16.vlgmr.msra.gmra.mxu0 %vm459_vm2, %v1218_v38 }
0x13ee   : > { %2135 = vmatpush3.bf16.msra.mxu0 %v2775_v52  ;;  %2142 = vmatprep.mubr.msk.bf16.mxu0 %vm2472_vm1, %v2471_v3 }
0x13ef   : > { %2136 = vmatprep.subr.bf16.mxu0 %v2471_v3 }
0x13f2   : > { %2137 = vmatpush3.bf16.msra.mxu0 %v2780_v53 }
0x13f3   : > { %2138 = vmatprep.subr.bf16.mxu0 %v2471_v3 }
0x13f6   : > { %2139 = vmatpush3.bf16.msra.mxu0 %v2785_v54 }
0x13f7   : > { %2140 = vmatprep.subr.bf16.mxu0 %v2471_v3 }
0x13fa   : > { %2141 = vmatpush3.bf16.msra.mxu0 %v2790_v56 }
0x13fb   : > { %2160 = vmatprep.subr.bf16.mxu0 %v2471_v3 }
0x14ad   : > { %v1256_v39 = vpop.f32.mrf.mxu0 }
0x14ae   : > { %v1257_v40 = vadd.f32 %v1256_v39, %v2796_v58  ;;  %v1356_v39 = vstv %s2905_s13 }
0x14af   : > { %v2132_v12 = vpop.f32.mrf.mxu0 }
0x14b0   : > { %v1961_v41 = vmul.f32 -1.442695, %v1257_v40 }
0x14b1   : > { %v1259_v45 = vpop.f32.mrf.mxu0 }
0x14b2   : > { %2331 = vpow2.f32 %v1961_v41 }
0x14b3   : > { %v2133_v47 = vpop.f32.mrf.mxu0 }
0x14bf   : > { %v2332_v8 = vpop.eup %2331 }
0x14c0   : > { %v1265_v18 = vadd.f32 1.0, %v2332_v8 }
0x14c2   : > { %2333 = vrcp.f32 %v1265_v18 }
0x14cf   : > { %v2334_v57 = vpop.eup %2333 }
0x14d0   : > { %v1268_v59 = vmul.f32 %v2334_v57, %v1257_v40 }
0x14d2   : > { %v1269_v60 = vpack.c.bf16 %v1268_v59, %v1268_v59 }
0x14d4   : > { %2143 = vmatmul.mubr.msk.bf16.vlgmr.msra.gmra.mxu0 %vm669_vm6, %v1269_v60 }
0x14d5   : > { %2162 = vmatprep.mubr.msk.bf16.mxu0 %vm2472_vm1, %v2471_v3 }
0x1594   : > { %v1307_v61 = vpop.f32.mrf.mxu0 }
0x1595   : > { %v1308_v62 = vadd.f32 %v1307_v61, %v2804_v16 }
0x1596   : > { %v2144_v63 = vpop.f32.mrf.mxu0 }
0x1597   : > { %1314 = vrot.lane.b32.xlu0 %v1308_v62, %s2474_s26 }
0x1598   : > { %v1310_v0 = vpop.f32.mrf.mxu0 }
0x159a   : > { %v2145_v1 = vpop.f32.mrf.mxu0 }
0x1609   : > { %v1315_v2 = vpop.permute.xlu0 %1314 }
0x160a   : > { %v1317_v6 = vadd.f32 %v1315_v2, %v1214_v34  ;;  %v445_v34 = vld [vmem:[#allocation3] sm:$0xff] }
0x160c   : > { %1319 = vrot.lane.b32.xlu1 %v1317_v6, %s2475_s29 }
0x167e   : > { %v1320_v7 = vpop.permute.xlu1 %1319 }
0x167f   : > { %v1322_v9 = vsel %vm459_vm2, %v1320_v7, 0.0 }
0x1680   : > { %1323 = vadd.xlane.f32.xlu1 %v1322_v9 }
0x1691   : > { %1344 = vrot.lane.b32.xlu1 %v1342_v15, %s2475_s29 }
0x1709   : > { %v1324_v4 = vpop.xlane.xlu1 %1323 }
0x170a   : > { %v1325_v19 = vmul.f32 0.03125, %v1324_v4 }
0x170c   : > { %v1326_v20 = vsub.f32 %v1317_v6, %v1325_v19 }
0x170d   : > { %v1345_v32 = vpop.permute.xlu1 %1344 }
0x170e   : > { %v1327_v21 = vmul.f32 %v1326_v20, %v1326_v20  ;;  %v1347_v33 = vadd.f32 %v1345_v32, %v2655_v5 }
0x1710   : > { %1329 = vrot.lane.b32.xlu0 %v1327_v21, %s2475_s29 }
0x1782   : > { %v1330_v22 = vpop.permute.xlu0 %1329 }
0x1783   : > { %v1332_v23 = vsel %vm459_vm2, %v1330_v22, 0.0 }
0x1784   : > { %1333 = vadd.xlane.f32.xlu0 %v1332_v23 }
0x180d   : > { %v1334_v25 = vpop.xlane.xlu0 %1333 }
0x180e   : > { %v1335_v26 = vmul.f32 0.03125, %v1334_v25 }
0x1810   : > { %v1336_v27 = vadd.f32 1e-05, %v1335_v26 }
0x1812   : > { %2335 = vrsqrt.f32 %v1336_v27 }
0x181f   : > { %v2336_v29 = vpop.eup %2335 }
0x1820   : > { %v1338_v51 = vmul.f32 %v2336_v29, %v1326_v20 }
0x1822   : > { %v1339_v10 = vmul.f32 %v1338_v51, %v2819_v43 }
0x1824   : > { %v1340_v28 = vadd.f32 %v1339_v10, %v2821_v46 }
0x1826   : > { %v1349_v31 = vmul.f32 %v1348_v30, %v1340_v28 }
0x1828   : > { %1351 = vrot.lane.b32.xlu0 %v1349_v31, %s2475_s29 }
0x189a   : > { %v1352_v35 = vpop.permute.xlu0 %1351 }
0x189b   : > { %v2908_v38 = vadd.f32 %v1352_v35, %v1347_v33 }
0x189d   : > { %v2912_v40 = vadd.f32 %v2908_v38, %v445_v34 }
0x189f   : > { %v1357_v12 = vmul.f32 %v1356_v39, %v2912_v40 }
0x18a1   : > { %v1358_v41 = vpack.c.bf16 %v1357_v12, %v1357_v12 }
0x18a3   : > { %2151 = vmatmul.mubr.msk.bf16.vlgmr.msra.gmra.mxu1 %vm459_vm2, %v1358_v41 }
0x18a4   : > { %2156 = vmatprep.mubr.msk.bf16.mxu1 %vm2472_vm1, %v2471_v3 }
0x1963   : > { %v1396_v45 = vpop.f32.mrf.mxu1 }
0x1964   : > { %v1411_v5 = vmul.f32 %v1396_v45, %v2676_v13  ;;  %v1409_v57 = vmul.f32 %v1396_v45, %v2684_v17  ;;  %v1964_v13 = vmul.f32 -1.442695, %v1396_v45 }
0x1965   : > { %v2152_v47 = vpop.f32.mrf.mxu1 }
0x1966   : > { %v1412_v8 = vadd.f32 %v1411_v5, %v2679_v14  ;;  %v1410_v62 = vadd.f32 %v1409_v57, %v2693_v24  ;;  %2337 = vpow2.f32 %v1964_v13 }
0x1967   : > { %v1399_v18 = vpop.f32.mrf.mxu1 }
0x1968   : > { %v1414_v59 = vpack.c.bf16 %v1412_v8, %v1412_v8  ;;  %v1413_v63 = vpack.c.bf16 %v1410_v62, %v1410_v62 }
0x1969   : > { %v2153_v60 = vpop.f32.mrf.mxu1 }
0x196a   : > { %v1419_v61 = vsel %vm532_vm3, %v1414_v59, 0 }
0x196b   : > { %2155 = vmatpush3.bf16.xpose.msra.mxu1 %v1419_v61 }
0x196c   : > { %2166 = vmatprep.subr.bf16.mxu1 %v2471_v3 }
0x1972   : > { %2157 = vmatmul.mubr.msk.bf16.vlgmr.msra.gmra.mxu1 %vm532_vm3, %v1413_v63 }
0x1973   : > { %2167 = vmatpush3.bf16.msra.mxu1 %v2712_v48  ;;  %2174 = vmatprep.mubr.msk.bf16.mxu1 %vm2472_vm1, %v2471_v3  ;;  %v2338_v14 = vpop.eup %2337 }
0x1974   : > { %2168 = vmatprep.subr.bf16.mxu1 %v2471_v3  ;;  %v1405_v17 = vadd.f32 1.0, %v2338_v14 }
0x1976   : > { %2339 = vrcp.f32 %v1405_v17 }
0x1977   : > { %2169 = vmatpush3.bf16.msra.mxu1 %v2716_v49 }
0x1978   : > { %2170 = vmatprep.subr.bf16.mxu1 %v2471_v3 }
0x197b   : > { %2171 = vmatpush3.bf16.msra.mxu1 %v2721_v50 }
0x197c   : > { %2172 = vmatprep.subr.bf16.mxu1 %v2471_v3 }
0x197f   : > { %2173 = vmatpush3.bf16.msra.mxu1 %v2730_v55 }
0x1983   : > { %v2340_v6 = vpop.eup %2339 }
0x1984   : > { %v1408_v7 = vmul.f32 %v2340_v6, %v1396_v45  ;;  %v1580_v41 = vsub.f32 1.0, %v2340_v6 }
0x1986   : > { %v1474_v50 = vpack.c.bf16 %v1408_v7, %v1408_v7 }
0x1a32   : > { %v1455_v24 = vpop.f32.mrf.mxu1 }
0x1a33   : > { %v1461_v48 = vmul.f32 0.25, %v1455_v24 }
0x1a34   : > { %v2158_v0 = vpop.f32.mrf.mxu1 }
0x1a35   : > { %v1462_v1 = vsel %vm580_vm5, %v1461_v48, -inf }
0x1a36   : > { %1463 = vmax.xlane.f32.xlu1 %v1462_v1  ;;  %v1458_v49 = vpop.f32.mrf.mxu1 }
0x1a38   : > { %v2159_v2 = vpop.f32.mrf.mxu1 }
0x1a47   : > { %1476 = vrot.lane.b32.xlu1 %v1474_v50, %s2473_s24  ;;  %s2476_s24 = smov [#allocation7]  }
0x1a4b   : > { %1582 = vrot.lane.b32.xlu1 %v1357_v12, %s2474_s26 }
0x1abf   : > { %v1464_v55 = vpop.xlane.xlu1 %1463 }
0x1ac0   : > { %v1465_v9 = vsub.f32 %v1461_v48, %v1464_v55 }
0x1ac2   : > { %v1466_v11 = vmul.f32 1.442695, %v1465_v9 }
0x1ac3   : > { %v1477_v15 = vpop.permute.xlu1 %1476 }
0x1ac4   : > { %2341 = vpow2.f32 %v1466_v11  ;;  %v1482_v4 = vsel %vm600_vm4, %v1477_v15, 0 }
0x1ac5   : > { %2161 = vmatpush3.bf16.msra.mxu0 %v1482_v4 }
0x1ac6   : > { %2178 = vmatprep.subr.bf16.mxu0 %v2471_v3 }
0x1ac7   : > { %v1583_v12 = vpop.permute.xlu1 %1582 }
0x1ac8   : > { %v1585_v5 = vmul.f32 %v1583_v12, %v1580_v41 }
0x1ad1   : > { %v2342_v19 = vpop.eup %2341 }
0x1ad2   : > { %v1468_v20 = vsel %vm580_vm5, %v2342_v19, 0.0 }
0x1ad3   : > { %1469 = vadd.xlane.f32.xlu0 %v1468_v20 }
0x1b5c   : > { %v1470_v21 = vpop.xlane.xlu0 %1469 }
0x1b5d   : > { %2343 = vrcp.f32 %v1470_v21 }
0x1b6a   : > { %v2344_v22 = vpop.eup %2343 }
0x1b6b   : > { %v1472_v23 = vmul.f32 %v2344_v22, %v2342_v19 }
0x1b6d   : > { %v1473_v25 = vpack.c.bf16 %v1472_v23, %v1472_v23 }
0x1b6f   : > { %2163 = vmatmul.mubr.msk.bf16.vlgmr.msra.gmra.mxu0 %vm580_vm5, %v1473_v25 }
0x1b70   : > { %2179 = vmatpush3.bf16.msra.mxu0 %v2755_v36  ;;  %2182 = vmatprep.mubr.msk.bf16.mxu0 %vm2472_vm1, %v2471_v3 }
0x1b71   : > { %2180 = vmatprep.subr.bf16.mxu0 %v2471_v3 }
0x1b74   : > { %2181 = vmatpush3.bf16.msra.mxu0 %v2759_v37 }
0x1b75   : > { %2186 = vmatprep.subr.bf16.mxu0 %v2471_v3 }
0x1c2f   : > { %v1518_v26 = vpop.f32.mrf.mxu0 }
0x1c30   : > { %v1524_v27 = vpack.c.bf16 %v1518_v26, %v1518_v26 }
0x1c31   : > { %v2164_v29 = vpop.f32.mrf.mxu0 }
0x1c32   : > { %2175 = vmatmul.mubr.msk.bf16.vlgmr.msra.gmra.mxu1 %vm669_vm6, %v1524_v27 }
0x1c33   : > { %v1521_v51 = vpop.f32.mrf.mxu0 }
0x1c35   : > { %v2165_v10 = vpop.f32.mrf.mxu0 }
0x1cf2   : > { %v1562_v30 = vpop.f32.mrf.mxu1 }
0x1cf3   : > { %v1968_v28 = vmul.f32 -1.442695, %v1562_v30 }
0x1cf4   : > { %v2176_v31 = vpop.f32.mrf.mxu1 }
0x1cf5   : > { %2345 = vpow2.f32 %v1968_v28 }
0x1cf6   : > { %v1565_v36 = vpop.f32.mrf.mxu1 }
0x1cf8   : > { %v2177_v32 = vpop.f32.mrf.mxu1 }
0x1d02   : > { %v2346_v33 = vpop.eup %2345 }
0x1d03   : > { %v1571_v34 = vadd.f32 1.0, %v2346_v33 }
0x1d05   : > { %2347 = vrcp.f32 %v1571_v34 }
0x1d12   : > { %v2348_v35 = vpop.eup %2347 }
0x1d13   : > { %v1574_v37 = vmul.f32 %v2348_v35, %v1562_v30 }
0x1d15   : > { %1576 = vrot.lane.b32.xlu0 %v1574_v37, %s2474_s26 }
0x1d87   : > { %v1577_v45 = vpop.permute.xlu0 %1576 }
0x1d88   : > { %v1579_v47 = vmul.f32 %v2340_v6, %v1577_v45 }
0x1d8a   : > { %v1586_v8 = vadd.f32 %v1585_v5, %v1579_v47 }
0x1d8c   : > { %1588 = vrot.lane.b32.xlu1 %v1586_v8, %s2475_s29 }
0x1dfe   : > { %v1589_v18 = vpop.permute.xlu1 %1588 }
0x1dff   : > { %v1591_v57 = vsel %vm459_vm2, %v1589_v18, 0.0 }
0x1e00   : > { %1592 = vadd.xlane.f32.xlu0 %v1591_v57 }
0x1e89   : > { %v1593_v59 = vpop.xlane.xlu0 %1592 }
0x1e8a   : > { %v1594_v60 = vmul.f32 0.03125, %v1593_v59 }
0x1e8c   : > { %v1595_v61 = vsub.f32 %v1586_v8, %v1594_v60 }
0x1e8e   : > { %v1596_v62 = vmul.f32 %v1595_v61, %v1595_v61 }
0x1e90   : > { %1598 = vrot.lane.b32.xlu1 %v1596_v62, %s2475_s29 }
0x1f02   : > { %v1599_v63 = vpop.permute.xlu1 %1598 }
0x1f03   : > { %v1601_v13 = vsel %vm459_vm2, %v1599_v63, 0.0 }
0x1f04   : > { %1602 = vadd.xlane.f32.xlu1 %v1601_v13 }
0x1f8d   : > { %v1603_v14 = vpop.xlane.xlu1 %1602 }
0x1f8e   : > { %v1604_v17 = vmul.f32 0.03125, %v1603_v14 }
0x1f90   : > { %v1605_v24 = vadd.f32 1e-05, %v1604_v17 }
0x1f92   : > { %2349 = vrsqrt.f32 %v1605_v24 }
0x1f9f   : > { %v2350_v48 = vpop.eup %2349 }
0x1fa0   : > { %v1607_v0 = vmul.f32 %v2350_v48, %v1595_v61 }
0x1fa2   : > { %v1608_v1 = vmul.f32 %v1607_v0, %v2764_v42 }
0x1fa4   : > { %v1609_v49 = vadd.f32 %v1608_v1, %v2766_v44 }
0x1fa6   : > { %v1610_v2 = vpack.c.bf16 %v1609_v49, %v1609_v49 }
0x1fa8   : > { %1612 = vrot.lane.b32.xlu0 %v1610_v2, %s2475_s29 }
0x201a   : > { %v1613_v6 = vpop.permute.xlu0 %1612 }
0x201b   : > { %2183 = vmatmul.mubr.msk.bf16.vlgmr.msra.gmra.mxu0 %vm459_vm2, %v1613_v6 }
0x201c   : > { %2187 = vmatpush3.bf16.msra.mxu0 %v2775_v52  ;;  %2194 = vmatprep.mubr.msk.bf16.mxu0 %vm2472_vm1, %v2471_v3 }
0x201d   : > { %2188 = vmatprep.subr.bf16.mxu0 %v2471_v3 }
0x2020   : > { %2189 = vmatpush3.bf16.msra.mxu0 %v2780_v53 }
0x2021   : > { %2190 = vmatprep.subr.bf16.mxu0 %v2471_v3 }
0x2024   : > { %2191 = vmatpush3.bf16.msra.mxu0 %v2785_v54 }
0x2025   : > { %2192 = vmatprep.subr.bf16.mxu0 %v2471_v3 }
0x2028   : > { %2193 = vmatpush3.bf16.msra.mxu0 %v2790_v56 }
0x20db   : > { %v1651_v42 = vpop.f32.mrf.mxu0 }
0x20dc   : > { %v1652_v44 = vadd.f32 %v1651_v42, %v2796_v58 }
0x20dd   : > { %v2184_v7 = vpop.f32.mrf.mxu0 }
0x20de   : > { %v1970_v52 = vmul.f32 -1.442695, %v1652_v44 }
0x20df   : > { %v1654_v50 = vpop.f32.mrf.mxu0 }
0x20e0   : > { %2351 = vpow2.f32 %v1970_v52 }
0x20e1   : > { %v2185_v55 = vpop.f32.mrf.mxu0 }
0x20ed   : > { %v2352_v9 = vpop.eup %2351 }
0x20ee   : > { %v1660_v11 = vadd.f32 1.0, %v2352_v9 }
0x20f0   : > { %2353 = vrcp.f32 %v1660_v11 }
0x20fd   : > { %v2354_v53 = vpop.eup %2353 }
0x20fe   : > { %v1663_v15 = vmul.f32 %v2354_v53, %v1652_v44 }
0x2100   : > { %v1664_v4 = vpack.c.bf16 %v1663_v15, %v1663_v15 }
0x2102   : > { %2195 = vmatmul.mubr.msk.bf16.vlgmr.msra.gmra.mxu0 %vm669_vm6, %v1664_v4 }
0x21c2   : > { %v1702_v54 = vpop.f32.mrf.mxu0 }
0x21c3   : > { %v1703_v3 = vadd.f32 %v1702_v54, %v2804_v16 }
0x21c4   : > { %v2196_v56 = vpop.f32.mrf.mxu0 }
0x21c5   : > { %1709 = vrot.lane.b32.xlu1 %v1703_v3, %s2474_s26 }
0x21c6   : > { %v1705_v58 = vpop.f32.mrf.mxu0 }
0x21c8   : > { %v2197_v19 = vpop.f32.mrf.mxu0 }
0x2237   : > { %v1710_v20 = vpop.permute.xlu1 %1709 }
0x2238   : > { %v1712_v21 = vadd.f32 %v1710_v20, %v1609_v49 }
0x223a   : > { %1714 = vrot.lane.b32.xlu0 %v1712_v21, %s2475_s29 }
0x22ac   : > { %v1715_v22 = vpop.permute.xlu0 %1714 }
0x22ad   : > { %v1717_v23 = vsel %vm459_vm2, %v1715_v22, 0.0 }
0x22ae   : > { %1718 = vadd.xlane.f32.xlu0 %v1717_v23 }
0x22c4   : > { %1737 = vrot.lane.b32.xlu0 %v2908_v38, %s2474_s26  ;;  %s2376_s26 = sshll.u32 %s2476_s24, 4  ;;  %s2377_s26 = int_to_ptr.vmem [resolvable:$false] %s2376_s26 }
0x22c5   : > { %p2379_p1 = scmp.lt.s32.totalorder %s1769_s18, %s2377_s26 }
0x2337   : > { %v1719_v25 = vpop.xlane.xlu0 %1718 }
0x2338   : > { %v1720_v26 = vmul.f32 0.03125, %v1719_v25 }
0x233a   : > { %v1721_v27 = vsub.f32 %v1712_v21, %v1720_v26 }
0x233b   : > { %v1738_v33 = vpop.permute.xlu0 %1737 }
0x233c   : > { %v1722_v16 = vmul.f32 %v1721_v27, %v1721_v27 }
0x233e   : > { %1724 = vrot.lane.b32.xlu1 %v1722_v16, %s2475_s29 }
0x23b0   : > { %v1725_v29 = vpop.permute.xlu1 %1724 }
0x23b1   : > { %v1727_v51 = vsel %vm459_vm2, %v1725_v29, 0.0 }
0x23b2   : > { %1728 = vadd.xlane.f32.xlu1 %v1727_v51 }
0x243b   : > { %v1729_v10 = vpop.xlane.xlu1 %1728 }
0x243c   : > { %v1730_v30 = vmul.f32 0.03125, %v1729_v10 }
0x243e   : > { %v1731_v28 = vadd.f32 1e-05, %v1730_v30 }
0x2440   : > { %2355 = vrsqrt.f32 %v1731_v28 }
0x244d   : > { %v2356_v31 = vpop.eup %2355 }
0x244e   : > { %v1733_v38 = vmul.f32 %v2356_v31, %v1721_v27 }
0x2450   : > { %v1734_v36 = vmul.f32 %v1733_v38, %v2819_v43 }
0x2452   : > { %v1735_v32 = vadd.f32 %v1734_v36, %v2821_v46 }
0x2454   : > { %v1740_v34 = vsub.f32 %v1735_v32, %v1738_v33 }
0x2456   : > { %1742 = vrot.lane.b32.xlu1 %v1740_v34, %s2475_s29  ;;  %s2378_s29 = scalar_lea.vmem %s2377_s26, 128 }
0x2457   : > { %p2380_p2 = scmp.lt.s32.totalorder %s2378_s29, %s2372_s0 }
0x2459   : > { %p2381_p4 = por %p2380_p2, %p2379_p1 }
0x245b   : > { %p2382_p5 = pnand %p2381_p4, %p2375_p0 }
0x24c8   : > { %v1743_v35 = vpop.permute.xlu1 %1742 }
0x24c9   : > { %v1745_v37 = vadd.f32 %v1743_v35, %v2912_v40 }
0x24cb   : > { %v1746_v12 = vmul.f32 %v1745_v37, %v1356_v39  ;;  %1748 = vst.msk [vmem:[#allocation3] sm:$0xff] %vm459_vm2, %v1745_v37 }
0x24cd   : > { %1747 = vst.msk [vmem:[#allocation2] sm:$0xff] %vm459_vm2, %v1746_v12  ;;  %v1749_v43 = vpack.c.bf16 %v1746_v12, %v1746_v12 }
0x24cf   : > { %1751 = vst.msk [vmem:[%s372_s19] sm:$0xf] %vm1750_vm7, %v1749_v43 }
0x24d0   : > { %2385 = shalt.err (!%p2382_p5)
}
0x24d1   : > { %s2386_s30 = scalar_lea.hbm %s1766_s27, 64  ;;  %s2390_s11 = scalar_lea.hbm %s3044_s7, 256 }
0x24d2   : > { %p2387_p6 = scmp.ne.s32.totalorder %s1766_s27, %s2386_s30  ;;  %p2391_p8 = scmp.lt.s32.totalorder %s1766_s27, %s3044_s7 }
0x24d3   : > { %p2392_p10 = scmp.lt.s32.totalorder %s2390_s11, %s2386_s30 }
0x24d4   : > { %p2388_p7 = pnand %p2387_p6, %p2569_p3 }
0x24d5   : > { %p2393_p11 = por %p2392_p10, %p2391_p8 }
0x24d6   : > { %p2389_p9 = pneg %p2388_p7 }
0x24d8   : > { %p2394_p12 = pnand %p2393_p11, %p2389_p9 }
0x24da   : > { %2397 = shalt.err (!%p2394_p12)
}
0x24db   : > { %2202 = dma.vmem_to_hbm [thread:$0]  (%p2569_p3), %s1769_s18, 64, %s1766_s27, %s1753_s20  }
0x24dc PF: > { %s3068_s10 = sld [smem:[#allocation10_spill]]  ;;  %p2214_p13 = scmp.ge.s32.totalorder %s2468_s8, 2 }
0x24dd   : > { %s3069_s13 = sld [smem:[#allocation16_spill]] }
0x24e2   : > { %s1780_s23 = sand.u32 1, %s3068_s10  }
0x24e3   : > { %p3070_p0 = scmp.ne.s32.totalorder %s3069_s13, 0  ;;  %s1781_s14 = scalar_lea.sflag [#allocation5], %s1780_s23 }
0x24e5   : > { %p2209_p1 = pnand %p2214_p13, %p3070_p0 }
0x24e7   : > { %p2210_p2 = pneg %p2209_p1 }
0x24e9   : > { %2435 = dma.done.wait (%p2210_p2), %s1781_s14, 64  }
0x24ea   : > { %2437 = vsyncadd (%p2210_p2), %s1781_s14, 4294967232  ;;  %s21_s8 = sadd.s32 1, %s2468_s8   ;;  %s3071_s9 = sld [smem:[#allocation11_spill]] }
0x24eb   : > { %p18_p4 = scmp.ge.s32.totalorder %s21_s8, 6   ;;  %s3072_s26 = sld [smem:[#allocation17_spill]] }
0x24ec   : > { %s3073_s27 = sld [smem:[#allocation12_spill]]  ;;  %s3077_s24 = smov %s2444_s25 }
0x24ed   : > { %s3074_s28 = sld [smem:[#allocation13_spill]]  ;;  %20 = sbr.rel (!%p18_p4) target bundleno = 8 (0x8), region = 107 }
0x24ee   : > { %s3075_s29 = sld [smem:[#allocation14_spill]] }
0x24ef   : > { %s3076_s30 = sld [smem:[#allocation15_spill]] }
0x24f0   : > { %s3078_s25 = smov %s3071_s9 }
0x24f2   :  { %1786 = vsyncpa [#allocation5], 1 }
0x24f3   :  { %1788 = vsyncpa [#allocation5 + $0x1], 1 }
0x24f4   :  { %1789 = vsyncpa [#allocation6], 1 }
0x24f5   :  { %1791 = vsyncpa [#allocation6 + $0x1], 1 }

</bundles_post_ra>
